<compile_context>
chip_gen: v7x
topology: tpu7x:2x2x1
jax: 0.10.0
libtpu: 0.0.40
codegen_flags: <defaults>
</compile_context>

<pallas_src>
from functools import partial

import jax
import jax.numpy as jnp
from jax import lax
from jax.experimental import pallas as pl
from jax.experimental.pallas import tpu as pltpu


def _round_up(v, m):
    return (v + m - 1) // m * m


# ----------------------------------------------------------------------------
# Fused kernel: ConvRelu(3x3) -> ConvTranspose2d(4,2,1) -> ReLU
# ----------------------------------------------------------------------------
def _decoder_block_kernel(x_ref, w1_ref, b1_ref, wd_ref, bt_ref, cm_ref,
                          o_ref, xpad_ref, ypad_ref, *, H, W, Cin):
    """Per batch element.  Flat width-padded layout (lanes = flattened space):

      padded grid = (H + 2) rows x Wp cols, Wp = W + 2, plus one guard row of
      Wp lanes in front and behind; interior pixel (i, j) lives at flat lane
      G + (1 + i) * Wp + (1 + j) with G = Wp.

      x_ref  : (1, Cin, H*W)        raw input block (no wrapper padding)
      w1_ref : (mid_p, 9*cin_p)     bf16 3x3 weights, tap-major / channel-minor
      b1_ref : (mid_p, 1)           f32
      wd_ref : (4*Cout, 9*mid_p)    bf16 merged deconv weights, rows = (dy,dx,co)
      bt_ref : (4*Cout, 1)          f32
      cm_ref : (1, H*Wp)            f32 interior-column mask
      o_ref  : (1, 4*Cout, H*Wp)    f32 parity-separated output (lane-dense)
      xpad   : (cin_p, (H+4)*Wp)    bf16 scratch, width-padded input
      ypad   : (mid_p, (H+4)*Wp)    bf16 scratch, width-padded ConvRelu output
    """
    bf16 = jnp.bfloat16
    Wp = W + 2
    D = H * Wp                      # matmul lane domain: padded rows 1..H, all cols
    G = Wp                          # guard lanes in front of padded-grid row 0
    S0 = G + Wp                     # flat offset of padded-grid row 1 (first interior row)
    back = G + (H + 1) * Wp         # flat offset of padded-grid row H+1 (bottom pad row)
    cin_p = xpad_ref.shape[0]
    mid_p = ypad_ref.shape[0]

    # ---- re-zero ONLY the small pad regions each step (not the whole scratch) ----
    zx = jnp.zeros((cin_p, 2 * Wp), bf16)
    xpad_ref[:, pl.ds(0, 2 * Wp)] = zx          # front guard + top pad row
    xpad_ref[:, pl.ds(back, 2 * Wp)] = zx       # bottom pad row + back guard
    zy = jnp.zeros((mid_p, 2 * Wp), bf16)
    ypad_ref[:, pl.ds(0, 2 * Wp)] = zy
    ypad_ref[:, pl.ds(back, 2 * Wp)] = zy

    # ---- scatter the raw input rows into the width-padded bf16 layout ----
    zrow = jnp.zeros((cin_p, Wp), bf16)
    for i in range(H):
        base = S0 + i * Wp
        xpad_ref[:, pl.ds(base, Wp)] = zrow                     # pad cols + pad channels
        xpad_ref[pl.ds(0, Cin), pl.ds(base + 1, W)] = (
            x_ref[0, :, pl.ds(i * W, W)].astype(bf16))          # interior data

    # ---- ConvRelu: one MXU matmul over a 9-tap im2col slab (no edge masks) ----
    slab = jnp.concatenate(
        [xpad_ref[:, pl.ds(S0 + (ky - 1) * Wp + (kx - 1), D)]
         for ky in range(3) for kx in range(3)],
        axis=0)                                                  # (9*cin_p, D) bf16
    y = jnp.dot(w1_ref[...], slab, preferred_element_type=jnp.float32)
    y = jnp.maximum(y + b1_ref[...], 0.0) * cm_ref[...]         # zero the pad columns
    ypad_ref[:, pl.ds(S0, D)] = y.astype(bf16)                  # stays resident in VMEM

    # ---- ConvTranspose2d(4,2,1) + ReLU: all four parities in ONE matmul ----
    slab2 = jnp.concatenate(
        [ypad_ref[:, pl.ds(S0 + r * Wp + c, D)]
         for r in (-1, 0, 1) for c in (-1, 0, 1)],
        axis=0)                                                  # (9*mid_p, D) bf16
    z = jnp.dot(wd_ref[...], slab2, preferred_element_type=jnp.float32)
    z = jnp.maximum(z + bt_ref[...], 0.0)                       # (4*Cout, D)
    o_ref[0] = z.astype(o_ref.dtype)


# ----------------------------------------------------------------------------
# One-time parameter re-layout (hoisted out of the per-call hot path)
# ----------------------------------------------------------------------------
def prepare_decoder_params(params):
    f32, bf16 = jnp.float32, jnp.bfloat16
    w1, b1, wt, bt = params["w1"], params["b1"], params["wt"], params["bt"]
    mid, Cin = w1.shape[0], w1.shape[1]
    Cout = wt.shape[1]
    cin_p = _round_up(Cin, 8)
    mid_p = _round_up(mid, 8)

    # 3x3 conv weights -> (mid_p, 9*cin_p), tap-major / channel-minor, bf16.
    w1m = jnp.transpose(w1.astype(f32), (0, 2, 3, 1))                 # (mid, 3, 3, Cin)
    w1m = jnp.pad(w1m, ((0, mid_p - mid), (0, 0), (0, 0), (0, cin_p - Cin)))
    w1m = w1m.reshape(mid_p, 9 * cin_p).astype(bf16)
    b1v = jnp.pad(b1.astype(f32), (0, mid_p - mid)).reshape(mid_p, 1)

    # Merged deconv weights: rows (dy, dx, cout), cols (tap(r,c), mid).
    # Output row 2a+dy takes y rows a+r with kernel row ky = dy + 1 - 2r when
    # 0 <= ky <= 3; same rule for columns.
    wt_f = wt.astype(f32)
    wd = jnp.zeros((4, Cout, 9, mid_p), f32)
    for dy in range(2):
        for dx in range(2):
            p = dy * 2 + dx
            for ti, r in enumerate((-1, 0, 1)):
                for tj, c in enumerate((-1, 0, 1)):
                    ky = dy + 1 - 2 * r
                    kx = dx + 1 - 2 * c
                    if 0 <= ky <= 3 and 0 <= kx <= 3:
                        wd = wd.at[p, :, ti * 3 + tj, :mid].set(wt_f[:, :, ky, kx].T)
    wd = wd.reshape(4 * Cout, 9 * mid_p).astype(bf16)
    bt4 = jnp.tile(bt.astype(f32).reshape(1, Cout), (4, 1)).reshape(4 * Cout, 1)

    return {"w1m": w1m, "b1v": b1v, "wd": wd, "bt4": bt4,
            "Cin": Cin, "cin_p": cin_p, "mid_p": mid_p, "Cout": Cout}


# ----------------------------------------------------------------------------
# Wrapper: single pallas_call + parity interleave
# ----------------------------------------------------------------------------
def decoder_block_v2(x_nchw, pp):
    """DecoderBlockV2(is_deconv=True): (N, Cin, H, W) -> (N, Cout, 2H, 2W)."""
    f32 = jnp.float32
    N, Cin, H, W = x_nchw.shape
    assert Cin == pp["Cin"]
    cin_p, mid_p, Cout = pp["cin_p"], pp["mid_p"], pp["Cout"]
    Wp = W + 2
    D = H * Wp
    Lx = (H + 4) * Wp
    HW = H * W

    # Raw input, only a free contiguous reshape -- no HBM padding pass.
    x2 = x_nchw.astype(f32).reshape(N, Cin, HW)

    # Interior-column mask for the intermediate y (tiny: (1, D) f32).
    col = jnp.arange(D, dtype=jnp.int32) % Wp
    cmask = ((col >= 1) & (col <= W)).astype(f32).reshape(1, D)

    kernel = partial(_decoder_block_kernel, H=H, W=W, Cin=Cin)
    out_ph = pl.pallas_call(
        kernel,
        out_shape=jax.ShapeDtypeStruct((N, 4 * Cout, D), f32),
        grid=(N,),
        in_specs=[
            pl.BlockSpec((1, Cin, HW), lambda n: (n, 0, 0)),
            # NOTE: at production sizes mark the invariant weight specs below
            # pipeline_mode=pl.Buffered(1) and add a row-strip grid axis + halo.
            pl.BlockSpec((mid_p, 9 * cin_p), lambda n: (0, 0)),
            pl.BlockSpec((mid_p, 1), lambda n: (0, 0)),
            pl.BlockSpec((4 * Cout, 9 * mid_p), lambda n: (0, 0)),
            pl.BlockSpec((4 * Cout, 1), lambda n: (0, 0)),
            pl.BlockSpec((1, D), lambda n: (0, 0)),
        ],
        out_specs=pl.BlockSpec((1, 4 * Cout, D), lambda n: (n, 0, 0)),
        scratch_shapes=[pltpu.VMEM((cin_p, Lx), jnp.bfloat16),
                        pltpu.VMEM((mid_p, Lx), jnp.bfloat16)],
        compiler_params=pltpu.CompilerParams(
            dimension_semantics=("parallel",),
            vmem_limit_bytes=48 * 1024 * 1024),
    )(x2, pp["w1m"], pp["b1v"], pp["wd"], pp["bt4"], cmask)

    # (N, (dy,dx,co), H*Wp) -> (N, Cout, 2H, 2W): drop pad columns, interleave
    # parities.  One XLA slice+transpose pass; a downstream consumer could take
    # the parity-separated kernel output directly and skip it entirely.
    out = out_ph.reshape(N, 2, 2, Cout, H, Wp)[:, :, :, :, :, 1:W + 1]
    out = jnp.transpose(out, (0, 3, 4, 1, 5, 2))                 # (N, Cout, H, dy, W, dx)
    return out.reshape(N, Cout, 2 * H, 2 * W)


# ----------------------------------------------------------------------------
# Pure-XLA reference for validation
# ----------------------------------------------------------------------------
def decoder_block_v2_ref(x_nchw, params):
    w1, b1, wt, bt = params["w1"], params["b1"], params["wt"], params["bt"]
    x = jnp.transpose(x_nchw, (0, 2, 3, 1))
    w1_hwio = jnp.transpose(w1, (2, 3, 1, 0))
    dn = ("NHWC", "HWIO", "NHWC")

    y = lax.conv_general_dilated(x, w1_hwio, (1, 1), ((1, 1), (1, 1)),
                                 dimension_numbers=dn)
    y = jax.nn.relu(y + b1)

    wt_hwio = jnp.transpose(jnp.flip(wt, axis=(2, 3)), (2, 3, 0, 1))
    z = lax.conv_general_dilated(y, wt_hwio, (1, 1), ((2, 2), (2, 2)),
                                 lhs_dilation=(2, 2), dimension_numbers=dn)
    z = jax.nn.relu(z + bt)
    return jnp.transpose(z, (0, 3, 1, 2))


# ----------------------------------------------------------------------------
if __name__ == "__main__":
    N, IN_C, MID_C, OUT_C, H, W = 2, 4, 8, 4, 16, 16

    key = jax.random.PRNGKey(0)
    k0, k1, k2, k3, k4 = jax.random.split(key, 5)

    x = jax.random.normal(k0, (N, IN_C, H, W), jnp.float32)

    params = {
        # nn.Conv2d(in, mid, 3, padding=1): weight (mid, in, 3, 3), bias (mid,)
        "w1": 0.1 * jax.random.normal(k1, (MID_C, IN_C, 3, 3), jnp.float32),
        "b1": 0.1 * jax.random.normal(k2, (MID_C,), jnp.float32),
        # nn.ConvTranspose2d(mid, out, 4, 2, 1): weight (mid, out, 4, 4), bias (out,)
        "wt": 0.1 * jax.random.normal(k3, (MID_C, OUT_C, 4, 4), jnp.float32),
        "bt": 0.1 * jax.random.normal(k4, (OUT_C,), jnp.float32),
    }

    prepped = prepare_decoder_params(params)          # once per weight set

    out = jax.block_until_ready(decoder_block_v2(x, prepped))
    assert out.shape == (N, OUT_C, 2 * H, 2 * W), out.shape

    ref = jax.block_until_ready(decoder_block_v2_ref(x, params))
    # bf16 matmul inputs with f32 accumulation -> loosened tolerance.
    max_err = float(jnp.max(jnp.abs(out - ref)))
    assert jnp.allclose(out, ref, rtol=5e-2, atol=5e-2), max_err

    print("KERNEL_OK")
</pallas_src>

<mosaic_0001>
module attributes {stable_mosaic.version = 11 : i64} {
  func.func @_decoder_block_kernel(%arg0: i32, %arg1: memref<1x4x256xf32, #tpu.memory_space<vmem>>, %arg2: memref<8x72xbf16, #tpu.memory_space<vmem>>, %arg3: memref<8x1xf32, #tpu.memory_space<vmem>>, %arg4: memref<16x72xbf16, #tpu.memory_space<vmem>>, %arg5: memref<16x1xf32, #tpu.memory_space<vmem>>, %arg6: memref<1x288xf32, #tpu.memory_space<vmem>>, %arg7: memref<1x16x288xf32, #tpu.memory_space<vmem>>, %arg8: memref<8x360xbf16, #tpu.memory_space<vmem>>, %arg9: memref<8x360xbf16, #tpu.memory_space<vmem>>) attributes {dimension_semantics = [#tpu.dimension_semantics<parallel>], iteration_bounds = array<i64: 2>, scalar_prefetch = 0 : i64, scratch_operands = 2 : i64, tpu.core_type = #tpu.core_type<tc>, window_params = [{transform_indices = @transform_0, window_bounds = array<i64: 1, 4, 256>}, {pipeline_mode = #tpu.pipeline_mode<synchronous>, transform_indices = @transform_1, window_bounds = array<i64: 8, 72>}, {pipeline_mode = #tpu.pipeline_mode<synchronous>, transform_indices = @transform_2, window_bounds = array<i64: 8, 1>}, {pipeline_mode = #tpu.pipeline_mode<synchronous>, transform_indices = @transform_3, window_bounds = array<i64: 16, 72>}, {pipeline_mode = #tpu.pipeline_mode<synchronous>, transform_indices = @transform_4, window_bounds = array<i64: 16, 1>}, {pipeline_mode = #tpu.pipeline_mode<synchronous>, transform_indices = @transform_5, window_bounds = array<i64: 1, 288>}, {transform_indices = @transform_6, window_bounds = array<i64: 1, 16, 288>}]} {
    %cst = arith.constant 0.000000e+00 : bf16
    %0 = vector.broadcast %cst : bf16 to vector<8x36xbf16>
    %c0 = arith.constant 0 : index
    %c0_0 = arith.constant 0 : index
    %1 = vector.load %arg8[%c0, %c0_0] : memref<8x360xbf16, #tpu.memory_space<vmem>>, vector<8x36xbf16>
    tpu.vector_store %arg8[%c0, %c0_0], %0 {strides = array<i32>} : memref<8x360xbf16, #tpu.memory_space<vmem>>, vector<8x36xbf16>,
    %c0_1 = arith.constant 0 : index
    %c324 = arith.constant 324 : index
    %2 = vector.load %arg8[%c0_1, %c324] : memref<8x360xbf16, #tpu.memory_space<vmem>>, vector<8x36xbf16>
    tpu.vector_store %arg8[%c0_1, %c324], %0 {strides = array<i32>} : memref<8x360xbf16, #tpu.memory_space<vmem>>, vector<8x36xbf16>,
    %cst_2 = arith.constant 0.000000e+00 : bf16
    %3 = vector.broadcast %cst_2 : bf16 to vector<8x36xbf16>
    %c0_3 = arith.constant 0 : index
    %c0_4 = arith.constant 0 : index
    %4 = vector.load %arg9[%c0_3, %c0_4] : memref<8x360xbf16, #tpu.memory_space<vmem>>, vector<8x36xbf16>
    tpu.vector_store %arg9[%c0_3, %c0_4], %3 {strides = array<i32>} : memref<8x360xbf16, #tpu.memory_space<vmem>>, vector<8x36xbf16>,
    %c0_5 = arith.constant 0 : index
    %c324_6 = arith.constant 324 : index
    %5 = vector.load %arg9[%c0_5, %c324_6] : memref<8x360xbf16, #tpu.memory_space<vmem>>, vector<8x36xbf16>
    tpu.vector_store %arg9[%c0_5, %c324_6], %3 {strides = array<i32>} : memref<8x360xbf16, #tpu.memory_space<vmem>>, vector<8x36xbf16>,
    %cst_7 = arith.constant 0.000000e+00 : bf16
    %6 = vector.broadcast %cst_7 : bf16 to vector<8x18xbf16>
    %c0_8 = arith.constant 0 : index
    %c36 = arith.constant 36 : index
    %7 = vector.load %arg8[%c0_8, %c36] : memref<8x360xbf16, #tpu.memory_space<vmem>>, vector<8x18xbf16>
    tpu.vector_store %arg8[%c0_8, %c36], %6 {strides = array<i32>} : memref<8x360xbf16, #tpu.memory_space<vmem>>, vector<8x18xbf16>,
    %c0_9 = arith.constant 0 : index
    %c0_10 = arith.constant 0 : index
    %c0_11 = arith.constant 0 : index
    %8 = vector.load %arg1[%c0_9, %c0_10, %c0_11] : memref<1x4x256xf32, #tpu.memory_space<vmem>>, vector<1x4x16xf32>
    %9 = vector.shape_cast %8 : vector<1x4x16xf32> to vector<4x16xf32>
    %10 = arith.truncf %9 : vector<4x16xf32> to vector<4x16xbf16>
    %c0_12 = arith.constant 0 : index
    %c37 = arith.constant 37 : index
    %11 = vector.load %arg8[%c0_12, %c37] : memref<8x360xbf16, #tpu.memory_space<vmem>>, vector<4x16xbf16>
    tpu.vector_store %arg8[%c0_12, %c37], %10 {strides = array<i32>} : memref<8x360xbf16, #tpu.memory_space<vmem>>, vector<4x16xbf16>,
    %c0_13 = arith.constant 0 : index
    %c54 = arith.constant 54 : index
    %12 = vector.load %arg8[%c0_13, %c54] : memref<8x360xbf16, #tpu.memory_space<vmem>>, vector<8x18xbf16>
    tpu.vector_store %arg8[%c0_13, %c54], %6 {strides = array<i32>} : memref<8x360xbf16, #tpu.memory_space<vmem>>, vector<8x18xbf16>,
    %c0_14 = arith.constant 0 : index
    %c0_15 = arith.constant 0 : index
    %c16 = arith.constant 16 : index
    %13 = vector.load %arg1[%c0_14, %c0_15, %c16] : memref<1x4x256xf32, #tpu.memory_space<vmem>>, vector<1x4x16xf32>
    %14 = vector.shape_cast %13 : vector<1x4x16xf32> to vector<4x16xf32>
    %15 = arith.truncf %14 : vector<4x16xf32> to vector<4x16xbf16>
    %c0_16 = arith.constant 0 : index
    %c55 = arith.constant 55 : index
    %16 = vector.load %arg8[%c0_16, %c55] : memref<8x360xbf16, #tpu.memory_space<vmem>>, vector<4x16xbf16>
    tpu.vector_store %arg8[%c0_16, %c55], %15 {strides = array<i32>} : memref<8x360xbf16, #tpu.memory_space<vmem>>, vector<4x16xbf16>,
    %c0_17 = arith.constant 0 : index
    %c72 = arith.constant 72 : index
    %17 = vector.load %arg8[%c0_17, %c72] : memref<8x360xbf16, #tpu.memory_space<vmem>>, vector<8x18xbf16>
    tpu.vector_store %arg8[%c0_17, %c72], %6 {strides = array<i32>} : memref<8x360xbf16, #tpu.memory_space<vmem>>, vector<8x18xbf16>,
    %c0_18 = arith.constant 0 : index
    %c0_19 = arith.constant 0 : index
    %c32 = arith.constant 32 : index
    %18 = vector.load %arg1[%c0_18, %c0_19, %c32] : memref<1x4x256xf32, #tpu.memory_space<vmem>>, vector<1x4x16xf32>
    %19 = vector.shape_cast %18 : vector<1x4x16xf32> to vector<4x16xf32>
    %20 = arith.truncf %19 : vector<4x16xf32> to vector<4x16xbf16>
    %c0_20 = arith.constant 0 : index
    %c73 = arith.constant 73 : index
    %21 = vector.load %arg8[%c0_20, %c73] : memref<8x360xbf16, #tpu.memory_space<vmem>>, vector<4x16xbf16>
    tpu.vector_store %arg8[%c0_20, %c73], %20 {strides = array<i32>} : memref<8x360xbf16, #tpu.memory_space<vmem>>, vector<4x16xbf16>,
    %c0_21 = arith.constant 0 : index
    %c90 = arith.constant 90 : index
    %22 = vector.load %arg8[%c0_21, %c90] : memref<8x360xbf16, #tpu.memory_space<vmem>>, vector<8x18xbf16>
    tpu.vector_store %arg8[%c0_21, %c90], %6 {strides = array<i32>} : memref<8x360xbf16, #tpu.memory_space<vmem>>, vector<8x18xbf16>,
    %c0_22 = arith.constant 0 : index
    %c0_23 = arith.constant 0 : index
    %c48 = arith.constant 48 : index
    %23 = vector.load %arg1[%c0_22, %c0_23, %c48] : memref<1x4x256xf32, #tpu.memory_space<vmem>>, vector<1x4x16xf32>
    %24 = vector.shape_cast %23 : vector<1x4x16xf32> to vector<4x16xf32>
    %25 = arith.truncf %24 : vector<4x16xf32> to vector<4x16xbf16>
    %c0_24 = arith.constant 0 : index
    %c91 = arith.constant 91 : index
    %26 = vector.load %arg8[%c0_24, %c91] : memref<8x360xbf16, #tpu.memory_space<vmem>>, vector<4x16xbf16>
    tpu.vector_store %arg8[%c0_24, %c91], %25 {strides = array<i32>} : memref<8x360xbf16, #tpu.memory_space<vmem>>, vector<4x16xbf16>,
    %c0_25 = arith.constant 0 : index
    %c108 = arith.constant 108 : index
    %27 = vector.load %arg8[%c0_25, %c108] : memref<8x360xbf16, #tpu.memory_space<vmem>>, vector<8x18xbf16>
    tpu.vector_store %arg8[%c0_25, %c108], %6 {strides = array<i32>} : memref<8x360xbf16, #tpu.memory_space<vmem>>, vector<8x18xbf16>,
    %c0_26 = arith.constant 0 : index
    %c0_27 = arith.constant 0 : index
    %c64 = arith.constant 64 : index
    %28 = vector.load %arg1[%c0_26, %c0_27, %c64] : memref<1x4x256xf32, #tpu.memory_space<vmem>>, vector<1x4x16xf32>
    %29 = vector.shape_cast %28 : vector<1x4x16xf32> to vector<4x16xf32>
    %30 = arith.truncf %29 : vector<4x16xf32> to vector<4x16xbf16>
    %c0_28 = arith.constant 0 : index
    %c109 = arith.constant 109 : index
    %31 = vector.load %arg8[%c0_28, %c109] : memref<8x360xbf16, #tpu.memory_space<vmem>>, vector<4x16xbf16>
    tpu.vector_store %arg8[%c0_28, %c109], %30 {strides = array<i32>} : memref<8x360xbf16, #tpu.memory_space<vmem>>, vector<4x16xbf16>,
    %c0_29 = arith.constant 0 : index
    %c126 = arith.constant 126 : index
    %32 = vector.load %arg8[%c0_29, %c126] : memref<8x360xbf16, #tpu.memory_space<vmem>>, vector<8x18xbf16>
    tpu.vector_store %arg8[%c0_29, %c126], %6 {strides = array<i32>} : memref<8x360xbf16, #tpu.memory_space<vmem>>, vector<8x18xbf16>,
    %c0_30 = arith.constant 0 : index
    %c0_31 = arith.constant 0 : index
    %c80 = arith.constant 80 : index
    %33 = vector.load %arg1[%c0_30, %c0_31, %c80] : memref<1x4x256xf32, #tpu.memory_space<vmem>>, vector<1x4x16xf32>
    %34 = vector.shape_cast %33 : vector<1x4x16xf32> to vector<4x16xf32>
    %35 = arith.truncf %34 : vector<4x16xf32> to vector<4x16xbf16>
    %c0_32 = arith.constant 0 : index
    %c127 = arith.constant 127 : index
    %36 = vector.load %arg8[%c0_32, %c127] : memref<8x360xbf16, #tpu.memory_space<vmem>>, vector<4x16xbf16>
    tpu.vector_store %arg8[%c0_32, %c127], %35 {strides = array<i32>} : memref<8x360xbf16, #tpu.memory_space<vmem>>, vector<4x16xbf16>,
    %c0_33 = arith.constant 0 : index
    %c144 = arith.constant 144 : index
    %37 = vector.load %arg8[%c0_33, %c144] : memref<8x360xbf16, #tpu.memory_space<vmem>>, vector<8x18xbf16>
    tpu.vector_store %arg8[%c0_33, %c144], %6 {strides = array<i32>} : memref<8x360xbf16, #tpu.memory_space<vmem>>, vector<8x18xbf16>,
    %c0_34 = arith.constant 0 : index
    %c0_35 = arith.constant 0 : index
    %c96 = arith.constant 96 : index
    %38 = vector.load %arg1[%c0_34, %c0_35, %c96] : memref<1x4x256xf32, #tpu.memory_space<vmem>>, vector<1x4x16xf32>
    %39 = vector.shape_cast %38 : vector<1x4x16xf32> to vector<4x16xf32>
    %40 = arith.truncf %39 : vector<4x16xf32> to vector<4x16xbf16>
    %c0_36 = arith.constant 0 : index
    %c145 = arith.constant 145 : index
    %41 = vector.load %arg8[%c0_36, %c145] : memref<8x360xbf16, #tpu.memory_space<vmem>>, vector<4x16xbf16>
    tpu.vector_store %arg8[%c0_36, %c145], %40 {strides = array<i32>} : memref<8x360xbf16, #tpu.memory_space<vmem>>, vector<4x16xbf16>,
    %c0_37 = arith.constant 0 : index
    %c162 = arith.constant 162 : index
    %42 = vector.load %arg8[%c0_37, %c162] : memref<8x360xbf16, #tpu.memory_space<vmem>>, vector<8x18xbf16>
    tpu.vector_store %arg8[%c0_37, %c162], %6 {strides = array<i32>} : memref<8x360xbf16, #tpu.memory_space<vmem>>, vector<8x18xbf16>,
    %c0_38 = arith.constant 0 : index
    %c0_39 = arith.constant 0 : index
    %c112 = arith.constant 112 : index
    %43 = vector.load %arg1[%c0_38, %c0_39, %c112] : memref<1x4x256xf32, #tpu.memory_space<vmem>>, vector<1x4x16xf32>
    %44 = vector.shape_cast %43 : vector<1x4x16xf32> to vector<4x16xf32>
    %45 = arith.truncf %44 : vector<4x16xf32> to vector<4x16xbf16>
    %c0_40 = arith.constant 0 : index
    %c163 = arith.constant 163 : index
    %46 = vector.load %arg8[%c0_40, %c163] : memref<8x360xbf16, #tpu.memory_space<vmem>>, vector<4x16xbf16>
    tpu.vector_store %arg8[%c0_40, %c163], %45 {strides = array<i32>} : memref<8x360xbf16, #tpu.memory_space<vmem>>, vector<4x16xbf16>,
    %c0_41 = arith.constant 0 : index
    %c180 = arith.constant 180 : index
    %47 = vector.load %arg8[%c0_41, %c180] : memref<8x360xbf16, #tpu.memory_space<vmem>>, vector<8x18xbf16>
    tpu.vector_store %arg8[%c0_41, %c180], %6 {strides = array<i32>} : memref<8x360xbf16, #tpu.memory_space<vmem>>, vector<8x18xbf16>,
    %c0_42 = arith.constant 0 : index
    %c0_43 = arith.constant 0 : index
    %c128 = arith.constant 128 : index
    %48 = vector.load %arg1[%c0_42, %c0_43, %c128] : memref<1x4x256xf32, #tpu.memory_space<vmem>>, vector<1x4x16xf32>
    %49 = vector.shape_cast %48 : vector<1x4x16xf32> to vector<4x16xf32>
    %50 = arith.truncf %49 : vector<4x16xf32> to vector<4x16xbf16>
    %c0_44 = arith.constant 0 : index
    %c181 = arith.constant 181 : index
    %51 = vector.load %arg8[%c0_44, %c181] : memref<8x360xbf16, #tpu.memory_space<vmem>>, vector<4x16xbf16>
    tpu.vector_store %arg8[%c0_44, %c181], %50 {strides = array<i32>} : memref<8x360xbf16, #tpu.memory_space<vmem>>, vector<4x16xbf16>,
    %c0_45 = arith.constant 0 : index
    %c198 = arith.constant 198 : index
    %52 = vector.load %arg8[%c0_45, %c198] : memref<8x360xbf16, #tpu.memory_space<vmem>>, vector<8x18xbf16>
    tpu.vector_store %arg8[%c0_45, %c198], %6 {strides = array<i32>} : memref<8x360xbf16, #tpu.memory_space<vmem>>, vector<8x18xbf16>,
    %c0_46 = arith.constant 0 : index
    %c0_47 = arith.constant 0 : index
    %c144_48 = arith.constant 144 : index
    %53 = vector.load %arg1[%c0_46, %c0_47, %c144_48] : memref<1x4x256xf32, #tpu.memory_space<vmem>>, vector<1x4x16xf32>
    %54 = vector.shape_cast %53 : vector<1x4x16xf32> to vector<4x16xf32>
    %55 = arith.truncf %54 : vector<4x16xf32> to vector<4x16xbf16>
    %c0_49 = arith.constant 0 : index
    %c199 = arith.constant 199 : index
    %56 = vector.load %arg8[%c0_49, %c199] : memref<8x360xbf16, #tpu.memory_space<vmem>>, vector<4x16xbf16>
    tpu.vector_store %arg8[%c0_49, %c199], %55 {strides = array<i32>} : memref<8x360xbf16, #tpu.memory_space<vmem>>, vector<4x16xbf16>,
    %c0_50 = arith.constant 0 : index
    %c216 = arith.constant 216 : index
    %57 = vector.load %arg8[%c0_50, %c216] : memref<8x360xbf16, #tpu.memory_space<vmem>>, vector<8x18xbf16>
    tpu.vector_store %arg8[%c0_50, %c216], %6 {strides = array<i32>} : memref<8x360xbf16, #tpu.memory_space<vmem>>, vector<8x18xbf16>,
    %c0_51 = arith.constant 0 : index
    %c0_52 = arith.constant 0 : index
    %c160 = arith.constant 160 : index
    %58 = vector.load %arg1[%c0_51, %c0_52, %c160] : memref<1x4x256xf32, #tpu.memory_space<vmem>>, vector<1x4x16xf32>
    %59 = vector.shape_cast %58 : vector<1x4x16xf32> to vector<4x16xf32>
    %60 = arith.truncf %59 : vector<4x16xf32> to vector<4x16xbf16>
    %c0_53 = arith.constant 0 : index
    %c217 = arith.constant 217 : index
    %61 = vector.load %arg8[%c0_53, %c217] : memref<8x360xbf16, #tpu.memory_space<vmem>>, vector<4x16xbf16>
    tpu.vector_store %arg8[%c0_53, %c217], %60 {strides = array<i32>} : memref<8x360xbf16, #tpu.memory_space<vmem>>, vector<4x16xbf16>,
    %c0_54 = arith.constant 0 : index
    %c234 = arith.constant 234 : index
    %62 = vector.load %arg8[%c0_54, %c234] : memref<8x360xbf16, #tpu.memory_space<vmem>>, vector<8x18xbf16>
    tpu.vector_store %arg8[%c0_54, %c234], %6 {strides = array<i32>} : memref<8x360xbf16, #tpu.memory_space<vmem>>, vector<8x18xbf16>,
    %c0_55 = arith.constant 0 : index
    %c0_56 = arith.constant 0 : index
    %c176 = arith.constant 176 : index
    %63 = vector.load %arg1[%c0_55, %c0_56, %c176] : memref<1x4x256xf32, #tpu.memory_space<vmem>>, vector<1x4x16xf32>
    %64 = vector.shape_cast %63 : vector<1x4x16xf32> to vector<4x16xf32>
    %65 = arith.truncf %64 : vector<4x16xf32> to vector<4x16xbf16>
    %c0_57 = arith.constant 0 : index
    %c235 = arith.constant 235 : index
    %66 = vector.load %arg8[%c0_57, %c235] : memref<8x360xbf16, #tpu.memory_space<vmem>>, vector<4x16xbf16>
    tpu.vector_store %arg8[%c0_57, %c235], %65 {strides = array<i32>} : memref<8x360xbf16, #tpu.memory_space<vmem>>, vector<4x16xbf16>,
    %c0_58 = arith.constant 0 : index
    %c252 = arith.constant 252 : index
    %67 = vector.load %arg8[%c0_58, %c252] : memref<8x360xbf16, #tpu.memory_space<vmem>>, vector<8x18xbf16>
    tpu.vector_store %arg8[%c0_58, %c252], %6 {strides = array<i32>} : memref<8x360xbf16, #tpu.memory_space<vmem>>, vector<8x18xbf16>,
    %c0_59 = arith.constant 0 : index
    %c0_60 = arith.constant 0 : index
    %c192 = arith.constant 192 : index
    %68 = vector.load %arg1[%c0_59, %c0_60, %c192] : memref<1x4x256xf32, #tpu.memory_space<vmem>>, vector<1x4x16xf32>
    %69 = vector.shape_cast %68 : vector<1x4x16xf32> to vector<4x16xf32>
    %70 = arith.truncf %69 : vector<4x16xf32> to vector<4x16xbf16>
    %c0_61 = arith.constant 0 : index
    %c253 = arith.constant 253 : index
    %71 = vector.load %arg8[%c0_61, %c253] : memref<8x360xbf16, #tpu.memory_space<vmem>>, vector<4x16xbf16>
    tpu.vector_store %arg8[%c0_61, %c253], %70 {strides = array<i32>} : memref<8x360xbf16, #tpu.memory_space<vmem>>, vector<4x16xbf16>,
    %c0_62 = arith.constant 0 : index
    %c270 = arith.constant 270 : index
    %72 = vector.load %arg8[%c0_62, %c270] : memref<8x360xbf16, #tpu.memory_space<vmem>>, vector<8x18xbf16>
    tpu.vector_store %arg8[%c0_62, %c270], %6 {strides = array<i32>} : memref<8x360xbf16, #tpu.memory_space<vmem>>, vector<8x18xbf16>,
    %c0_63 = arith.constant 0 : index
    %c0_64 = arith.constant 0 : index
    %c208 = arith.constant 208 : index
    %73 = vector.load %arg1[%c0_63, %c0_64, %c208] : memref<1x4x256xf32, #tpu.memory_space<vmem>>, vector<1x4x16xf32>
    %74 = vector.shape_cast %73 : vector<1x4x16xf32> to vector<4x16xf32>
    %75 = arith.truncf %74 : vector<4x16xf32> to vector<4x16xbf16>
    %c0_65 = arith.constant 0 : index
    %c271 = arith.constant 271 : index
    %76 = vector.load %arg8[%c0_65, %c271] : memref<8x360xbf16, #tpu.memory_space<vmem>>, vector<4x16xbf16>
    tpu.vector_store %arg8[%c0_65, %c271], %75 {strides = array<i32>} : memref<8x360xbf16, #tpu.memory_space<vmem>>, vector<4x16xbf16>,
    %c0_66 = arith.constant 0 : index
    %c288 = arith.constant 288 : index
    %77 = vector.load %arg8[%c0_66, %c288] : memref<8x360xbf16, #tpu.memory_space<vmem>>, vector<8x18xbf16>
    tpu.vector_store %arg8[%c0_66, %c288], %6 {strides = array<i32>} : memref<8x360xbf16, #tpu.memory_space<vmem>>, vector<8x18xbf16>,
    %c0_67 = arith.constant 0 : index
    %c0_68 = arith.constant 0 : index
    %c224 = arith.constant 224 : index
    %78 = vector.load %arg1[%c0_67, %c0_68, %c224] : memref<1x4x256xf32, #tpu.memory_space<vmem>>, vector<1x4x16xf32>
    %79 = vector.shape_cast %78 : vector<1x4x16xf32> to vector<4x16xf32>
    %80 = arith.truncf %79 : vector<4x16xf32> to vector<4x16xbf16>
    %c0_69 = arith.constant 0 : index
    %c289 = arith.constant 289 : index
    %81 = vector.load %arg8[%c0_69, %c289] : memref<8x360xbf16, #tpu.memory_space<vmem>>, vector<4x16xbf16>
    tpu.vector_store %arg8[%c0_69, %c289], %80 {strides = array<i32>} : memref<8x360xbf16, #tpu.memory_space<vmem>>, vector<4x16xbf16>,
    %c0_70 = arith.constant 0 : index
    %c306 = arith.constant 306 : index
    %82 = vector.load %arg8[%c0_70, %c306] : memref<8x360xbf16, #tpu.memory_space<vmem>>, vector<8x18xbf16>
    tpu.vector_store %arg8[%c0_70, %c306], %6 {strides = array<i32>} : memref<8x360xbf16, #tpu.memory_space<vmem>>, vector<8x18xbf16>,
    %c0_71 = arith.constant 0 : index
    %c0_72 = arith.constant 0 : index
    %c240 = arith.constant 240 : index
    %83 = vector.load %arg1[%c0_71, %c0_72, %c240] : memref<1x4x256xf32, #tpu.memory_space<vmem>>, vector<1x4x16xf32>
    %84 = vector.shape_cast %83 : vector<1x4x16xf32> to vector<4x16xf32>
    %85 = arith.truncf %84 : vector<4x16xf32> to vector<4x16xbf16>
    %c0_73 = arith.constant 0 : index
    %c307 = arith.constant 307 : index
    %86 = vector.load %arg8[%c0_73, %c307] : memref<8x360xbf16, #tpu.memory_space<vmem>>, vector<4x16xbf16>
    tpu.vector_store %arg8[%c0_73, %c307], %85 {strides = array<i32>} : memref<8x360xbf16, #tpu.memory_space<vmem>>, vector<4x16xbf16>,
    %c0_74 = arith.constant 0 : index
    %c17 = arith.constant 17 : index
    %87 = vector.load %arg8[%c0_74, %c17] : memref<8x360xbf16, #tpu.memory_space<vmem>>, vector<8x288xbf16>
    %c0_75 = arith.constant 0 : index
    %c18 = arith.constant 18 : index
    %88 = vector.load %arg8[%c0_75, %c18] : memref<8x360xbf16, #tpu.memory_space<vmem>>, vector<8x288xbf16>
    %c0_76 = arith.constant 0 : index
    %c19 = arith.constant 19 : index
    %89 = vector.load %arg8[%c0_76, %c19] : memref<8x360xbf16, #tpu.memory_space<vmem>>, vector<8x288xbf16>
    %c0_77 = arith.constant 0 : index
    %c35 = arith.constant 35 : index
    %90 = vector.load %arg8[%c0_77, %c35] : memref<8x360xbf16, #tpu.memory_space<vmem>>, vector<8x288xbf16>
    %c0_78 = arith.constant 0 : index
    %c36_79 = arith.constant 36 : index
    %91 = vector.load %arg8[%c0_78, %c36_79] : memref<8x360xbf16, #tpu.memory_space<vmem>>, vector<8x288xbf16>
    %c0_80 = arith.constant 0 : index
    %c37_81 = arith.constant 37 : index
    %92 = vector.load %arg8[%c0_80, %c37_81] : memref<8x360xbf16, #tpu.memory_space<vmem>>, vector<8x288xbf16>
    %c0_82 = arith.constant 0 : index
    %c53 = arith.constant 53 : index
    %93 = vector.load %arg8[%c0_82, %c53] : memref<8x360xbf16, #tpu.memory_space<vmem>>, vector<8x288xbf16>
    %c0_83 = arith.constant 0 : index
    %c54_84 = arith.constant 54 : index
    %94 = vector.load %arg8[%c0_83, %c54_84] : memref<8x360xbf16, #tpu.memory_space<vmem>>, vector<8x288xbf16>
    %c0_85 = arith.constant 0 : index
    %c55_86 = arith.constant 55 : index
    %95 = vector.load %arg8[%c0_85, %c55_86] : memref<8x360xbf16, #tpu.memory_space<vmem>>, vector<8x288xbf16>
    %96 = tpu.concatenate %87, %88, %89, %90, %91, %92, %93, %94, %95 in 0 : vector<8x288xbf16>, vector<8x288xbf16>, vector<8x288xbf16>, vector<8x288xbf16>, vector<8x288xbf16>, vector<8x288xbf16>, vector<8x288xbf16>, vector<8x288xbf16>, vector<8x288xbf16> -> vector<72x288xbf16>
    %c0_87 = arith.constant 0 : index
    %c0_88 = arith.constant 0 : index
    %97 = vector.load %arg2[%c0_87, %c0_88] : memref<8x72xbf16, #tpu.memory_space<vmem>>, vector<8x72xbf16>
    %cst_89 = arith.constant dense<0.000000e+00> : vector<8x288xf32>
    %98 = tpu.matmul %97, %96, %cst_89 {dimension_numbers = #tpu.dot_dimension_numbers<[1], [0], [0], [1], [0, 0, 1, 1], [], []>} : vector<8x72xbf16>, vector<72x288xbf16>, vector<8x288xf32> -> vector<8x288xf32>
    %c0_90 = arith.constant 0 : index
    %c0_91 = arith.constant 0 : index
    %99 = vector.load %arg3[%c0_90, %c0_91] : memref<8x1xf32, #tpu.memory_space<vmem>>, vector<8x1xf32>
    %100 = vector.broadcast %99 : vector<8x1xf32> to vector<8x288xf32>
    %101 = arith.addf %98, %100 : vector<8x288xf32>
    %cst_92 = arith.constant 0.000000e+00 : f32
    %102 = vector.broadcast %cst_92 : f32 to vector<8x288xf32>
    %103 = arith.maximumf %101, %102 : vector<8x288xf32>
    %c0_93 = arith.constant 0 : index
    %c0_94 = arith.constant 0 : index
    %104 = vector.load %arg6[%c0_93, %c0_94] : memref<1x288xf32, #tpu.memory_space<vmem>>, vector<1x288xf32>
    %105 = vector.broadcast %104 : vector<1x288xf32> to vector<8x288xf32>
    %106 = arith.mulf %103, %105 : vector<8x288xf32>
    %107 = arith.truncf %106 : vector<8x288xf32> to vector<8x288xbf16>
    %c0_95 = arith.constant 0 : index
    %c36_96 = arith.constant 36 : index
    %108 = vector.load %arg9[%c0_95, %c36_96] : memref<8x360xbf16, #tpu.memory_space<vmem>>, vector<8x288xbf16>
    tpu.vector_store %arg9[%c0_95, %c36_96], %107 {strides = array<i32>} : memref<8x360xbf16, #tpu.memory_space<vmem>>, vector<8x288xbf16>,
    %c0_97 = arith.constant 0 : index
    %c17_98 = arith.constant 17 : index
    %109 = vector.load %arg9[%c0_97, %c17_98] : memref<8x360xbf16, #tpu.memory_space<vmem>>, vector<8x288xbf16>
    %c0_99 = arith.constant 0 : index
    %c18_100 = arith.constant 18 : index
    %110 = vector.load %arg9[%c0_99, %c18_100] : memref<8x360xbf16, #tpu.memory_space<vmem>>, vector<8x288xbf16>
    %c0_101 = arith.constant 0 : index
    %c19_102 = arith.constant 19 : index
    %111 = vector.load %arg9[%c0_101, %c19_102] : memref<8x360xbf16, #tpu.memory_space<vmem>>, vector<8x288xbf16>
    %c0_103 = arith.constant 0 : index
    %c35_104 = arith.constant 35 : index
    %112 = vector.load %arg9[%c0_103, %c35_104] : memref<8x360xbf16, #tpu.memory_space<vmem>>, vector<8x288xbf16>
    %c0_105 = arith.constant 0 : index
    %c36_106 = arith.constant 36 : index
    %113 = vector.load %arg9[%c0_105, %c36_106] : memref<8x360xbf16, #tpu.memory_space<vmem>>, vector<8x288xbf16>
    %c0_107 = arith.constant 0 : index
    %c37_108 = arith.constant 37 : index
    %114 = vector.load %arg9[%c0_107, %c37_108] : memref<8x360xbf16, #tpu.memory_space<vmem>>, vector<8x288xbf16>
    %c0_109 = arith.constant 0 : index
    %c53_110 = arith.constant 53 : index
    %115 = vector.load %arg9[%c0_109, %c53_110] : memref<8x360xbf16, #tpu.memory_space<vmem>>, vector<8x288xbf16>
    %c0_111 = arith.constant 0 : index
    %c54_112 = arith.constant 54 : index
    %116 = vector.load %arg9[%c0_111, %c54_112] : memref<8x360xbf16, #tpu.memory_space<vmem>>, vector<8x288xbf16>
    %c0_113 = arith.constant 0 : index
    %c55_114 = arith.constant 55 : index
    %117 = vector.load %arg9[%c0_113, %c55_114] : memref<8x360xbf16, #tpu.memory_space<vmem>>, vector<8x288xbf16>
    %118 = tpu.concatenate %109, %110, %111, %112, %113, %114, %115, %116, %117 in 0 : vector<8x288xbf16>, vector<8x288xbf16>, vector<8x288xbf16>, vector<8x288xbf16>, vector<8x288xbf16>, vector<8x288xbf16>, vector<8x288xbf16>, vector<8x288xbf16>, vector<8x288xbf16> -> vector<72x288xbf16>
    %c0_115 = arith.constant 0 : index
    %c0_116 = arith.constant 0 : index
    %119 = vector.load %arg4[%c0_115, %c0_116] : memref<16x72xbf16, #tpu.memory_space<vmem>>, vector<16x72xbf16>
    %cst_117 = arith.constant dense<0.000000e+00> : vector<16x288xf32>
    %120 = tpu.matmul %119, %118, %cst_117 {dimension_numbers = #tpu.dot_dimension_numbers<[1], [0], [0], [1], [0, 0, 1, 1], [], []>} : vector<16x72xbf16>, vector<72x288xbf16>, vector<16x288xf32> -> vector<16x288xf32>
    %c0_118 = arith.constant 0 : index
    %c0_119 = arith.constant 0 : index
    %121 = vector.load %arg5[%c0_118, %c0_119] : memref<16x1xf32, #tpu.memory_space<vmem>>, vector<16x1xf32>
    %122 = vector.broadcast %121 : vector<16x1xf32> to vector<16x288xf32>
    %123 = arith.addf %120, %122 : vector<16x288xf32>
    %cst_120 = arith.constant 0.000000e+00 : f32
    %124 = vector.broadcast %cst_120 : f32 to vector<16x288xf32>
    %125 = arith.maximumf %123, %124 : vector<16x288xf32>
    %c0_121 = arith.constant 0 : index
    %c0_122 = arith.constant 0 : index
    %c0_123 = arith.constant 0 : index
    %126 = vector.load %arg7[%c0_121, %c0_122, %c0_123] : memref<1x16x288xf32, #tpu.memory_space<vmem>>, vector<1x16x288xf32>
    %127 = vector.shape_cast %126 : vector<1x16x288xf32> to vector<16x288xf32>
    %128 = vector.shape_cast %125 : vector<16x288xf32> to vector<1x16x288xf32>
    tpu.vector_store %arg7[%c0_121, %c0_122, %c0_123], %128 {strides = array<i32>} : memref<1x16x288xf32, #tpu.memory_space<vmem>>, vector<1x16x288xf32>,
    return
  }
  func.func @transform_0(%arg0: i32) -> (i32, i32, i32) {
    %c0_i32 = arith.constant 0 : i32
    %c0_i32_0 = arith.constant 0 : i32
    %c0_i32_1 = arith.constant 0 : i32
    return %arg0, %c0_i32, %c0_i32_0 : i32, i32, i32
  }
  func.func @transform_1(%arg0: i32) -> (i32, i32) {
    %c0_i32 = arith.constant 0 : i32
    %c0_i32_0 = arith.constant 0 : i32
    %c0_i32_1 = arith.constant 0 : i32
    return %c0_i32, %c0_i32_0 : i32, i32
  }
  func.func @transform_2(%arg0: i32) -> (i32, i32) {
    %c0_i32 = arith.constant 0 : i32
    %c0_i32_0 = arith.constant 0 : i32
    %c0_i32_1 = arith.constant 0 : i32
    return %c0_i32, %c0_i32_0 : i32, i32
  }
  func.func @transform_3(%arg0: i32) -> (i32, i32) {
    %c0_i32 = arith.constant 0 : i32
    %c0_i32_0 = arith.constant 0 : i32
    %c0_i32_1 = arith.constant 0 : i32
    return %c0_i32, %c0_i32_0 : i32, i32
  }
  func.func @transform_4(%arg0: i32) -> (i32, i32) {
    %c0_i32 = arith.constant 0 : i32
    %c0_i32_0 = arith.constant 0 : i32
    %c0_i32_1 = arith.constant 0 : i32
    return %c0_i32, %c0_i32_0 : i32, i32
  }
  func.func @transform_5(%arg0: i32) -> (i32, i32) {
    %c0_i32 = arith.constant 0 : i32
    %c0_i32_0 = arith.constant 0 : i32
    %c0_i32_1 = arith.constant 0 : i32
    return %c0_i32, %c0_i32_0 : i32, i32
  }
  func.func @transform_6(%arg0: i32) -> (i32, i32, i32) {
    %c0_i32 = arith.constant 0 : i32
    %c0_i32_0 = arith.constant 0 : i32
    %c0_i32_1 = arith.constant 0 : i32
    return %arg0, %c0_i32, %c0_i32_0 : i32, i32, i32
  }
}

</mosaic_0001>

<bundles_post_ra>
// kernel: tpu_custom_call.1
= control target key start
LH: loop header
LB: loop body
LE: loop exit
PB: predicated region body
PF: predicated region fallthrough
CT: control target
= control target key end

     0   :  { %11 = vsyncpa [#allocation5], 0  ;;  %s1865_s0 = inlined_call_operand.vmem [shape: f32[2,4,256], index: 0, kind: input, shape index: {}]   ;;  %s1866_s1 = inlined_call_operand.vmem [shape: bf16[8,72], index: 1, kind: input, shape index: {}]   ;;  %s1867_s2 = inlined_call_operand.vmem [shape: f32[8,1], index: 2, kind: input, shape index: {}]   ;;  %s1868_s3 = inlined_call_operand.vmem [shape: bf16[16,72], index: 3, kind: input, shape index: {}]   ;;  %s1869_s4 = inlined_call_operand.vmem [shape: f32[16,1], index: 4, kind: input, shape index: {}]   ;;  %s1870_s5 = inlined_call_operand.vmem [shape: f32[1,288], index: 5, kind: input, shape index: {}]   ;;  %s1871_s6 = inlined_call_operand.hbm [shape: f32[2,16,288], index: 6, kind: output, shape index: {}]  }
   0x1   :  { %13 = vsyncpa [#allocation5 + $0x1], 0  ;;  %s1485_s21 = smov 0   ;;  %s1487_s22 = smov 0  }
   0x2   :  { %s1489_s23 = smov 0   ;;  %s1491_s24 = smov 0  }
   0x3 LB: > { %s1506_s25 = sadd.s32 4294967295, %s1416_s24   ;;  %s1176_s26 = sadd.s32 4294967294, %s1416_s24   ;;  %s1416_s24 = sphi %s1491_s24, %s1877_s24   ;;  %s1412_s23 = sphi %s1489_s23, %s1876_s23   ;;  %s1408_s22 = sphi %s1487_s22, %s1875_s22   ;;  %s1404_s21 = sphi %s1485_s21, %s1874_s21  }
   0x4   : > { %s1510_s27 = sadd.s32 1, %s1416_s24   ;;  %s157_s28 = sadd.s32 1, %s1412_s23 }
   0x5   : > { %s154_s29 = ssub.s32 %s1416_s24, %s1510_s27  ;;  %p167_p0 = scmp.ne.s32.totalorder %s1412_s23, %s1408_s22 }
   0x6   : > { %p155_p1 = scmp.eq.s32.totalorder %s154_s29, 0  ;;  %p168_p2 = scmp.eq.s32.totalorder %s1506_s25, 1 }
   0x7   : > { %p173_p3 = scmp.ne.s32.totalorder %s1408_s22, %s1404_s21  ;;  %p174_p4 = scmp.eq.s32.totalorder %s1176_s26, 1 }
   0x8   : > { %s1521_s30 = scalar_select %p155_p1, %s1412_s23, %s157_s28  }
   0x9   : > { %p1523_p5 = por %p168_p2, %p167_p0  ;;  %p1527_p6 = por %p174_p4, %p173_p3 }
   0xa   : > { %p1179_p7 = scmp.ge.s32.totalorder %s1416_s24, 1  ;;  %p215_p8 = scmp.lt.s32.totalorder %s1416_s24, 3 }
   0xc   : > { %p216_p9 = pnand %p1179_p7, %p215_p8 }
   0xd   : > { %p245_p10 = scmp.lt.s32.totalorder (!%p216_p9), %s1506_s25, 1  ;;  %vm251_vm0 = vcmask (!%p216_p9), 289792   ;;  %vm257_vm1 = vcmask (!%p216_p9), 437536   ;;  %v1418_v0 = vmov (!%p216_p9), 0   ;;  %s1419_s14 = smov (!%p216_p9), 37   ;;  %vm253_vm2 = vcmask (!%p216_p9), 847392  }
   0xe   : > { %219 = sbr.rel (%p216_p9) target bundleno = 1343 (0x53f), region = 44  ;;  %252 = vst.msk [vmem:[#allocation2] sm:$0xf] (!%p216_p9), %vm251_vm0, %v1418_v0  ;;  %255 = vst.msk [vmem:[#allocation3] sm:$0xf] (!%p216_p9), %vm251_vm0, %v1418_v0  ;;  %699 = vmatprep.mubr.bf16.mxu0 (!%p216_p9), %v1418_v0  ;;  %1347 = vset.pattern.permute.xlu1 (!%p216_p9), %v1418_v0  ;;  %s1420_s15 = smov (!%p216_p9), 41  }
   0xf   : > { %258 = vst.msk [vmem:[#allocation2] sm:$0xf] (!%p216_p9), %vm257_vm1, %v1418_v0  ;;  %1348 = vset.pattern.permute.xlu0 (!%p216_p9), %v1418_v0  ;;  %s1421_s16 = smov (!%p216_p9), 39   ;;  %s1422_s17 = smov (!%p216_p9), 43   ;;  %vm267_vm3 = vcmask (!%p216_p9), 427304   ;;  %vm269_vm4 = vcmask (!%p216_p9), 585136  }
  0x10   : > { %s1423_s18 = smov (!%p216_p9), 47   ;;  %s1424_s19 = smov (!%p216_p9), 45   ;;  %254 = vst.msk [vmem:[#allocation2 + $0x8] sm:$0xf] (!%p216_p9), %vm253_vm2, %v1418_v0  ;;  %256 = vst.msk [vmem:[#allocation3 + $0x8] sm:$0xf] (!%p216_p9), %vm253_vm2, %v1418_v0 }
  0x11   : > { %s1425_s20 = smov (!%p216_p9), 49   ;;  %s1426_s26 = smov (!%p216_p9), 51   ;;  %vm279_vm5 = vcmask (!%p216_p9), 574904   ;;  %vm281_vm6 = vcmask (!%p216_p9), 732736   ;;  %vm291_vm7 = vcmask (!%p216_p9), 722504   ;;  %vm293_vm8 = vcmask (!%p216_p9), 880336  }
  0x12   : > { %s1427_s28 = smov (!%p216_p9), 53   ;;  %s1428_s29 = smov (!%p216_p9), 55   ;;  %vm303_vm9 = vcmask (!%p216_p9), 870104   ;;  %vm317_vm10 = vcmask (!%p216_p9), 1044464   ;;  %vm318_vm11 = vcmask (!%p216_p9), 130052   ;;  %vm305_vm12 = vcmask (!%p216_p9), 1027936  }
  0x13   : > { %s1431_s11 = smov (!%p216_p9), 59   ;;  %s1432_s12 = smov (!%p216_p9), 63   ;;  %vm332_vm13 = vcmask (!%p216_p9), 1042424   ;;  %vm333_vm14 = vcmask (!%p216_p9), 119812   ;;  %vm329_vm15 = vcmask (!%p216_p9), 384000   ;;  %vm315_vm0 = vcmask (!%p216_p9), 1017704   ;;  %vm319_vm1 = vmor (!%p216_p9), %vm318_vm11, %vm317_vm10 }
  0x14   : > { %vm334_vm2 = vmor (!%p216_p9), %vm333_vm14, %vm332_vm13  ;;  %vm382_vm10 = vcmask (!%p216_p9), 706104   ;;  %vm384_vm11 = vcmask (!%p216_p9), 863936   ;;  %vm408_vm13 = vcmask (!%p216_p9), 1044448   ;;  %vm409_vm14 = vcmask (!%p216_p9), 113668  }
  0x15   : > { %s246_s9 = scalar_select %p245_p10, %s1506_s25, 1 }
  0x17   : > { %s1216_s10 = sshll.u32 %s246_s9, 3  ;;  %s1429_s9 = smov 57  }
  0x18   : > { %s1544_s13 = scalar_lea.vmem %s1865_s0, %s1216_s10  ;;  %s1430_s10 = smov 61  }
  0x19   : > { %v259_v1 = vld [vmem:[%s1544_s13] sm:$0xf]  ;;  %v362_v17 = vld [vmem:[%s1544_s13 + $0x4] sm:$0xf] }
  0x1a   : > { %v283_v2 = vld [vmem:[%s1544_s13] sm:$0xf]  ;;  %v1217_v4 = vpack.c.bf16 %v259_v1, %v259_v1  ;;  %v374_v18 = vld [vmem:[%s1544_s13 + $0x4] sm:$0xf]  ;;  %v1225_v19 = vpack.c.bf16 %v362_v17, %v362_v17 }
  0x1b   : > { %v271_v3 = vld [vmem:[%s1544_s13] sm:$0xf]  ;;  %v1219_v5 = vpack.c.bf16 %v283_v2, %v283_v2  ;;  %v1226_v20 = vpack.c.bf16 %v374_v18, %v374_v18  ;;  %v386_v21 = vld [vmem:[%s1544_s13 + $0x4] sm:$0xf] }
  0x1c   : > { %v295_v6 = vld [vmem:[%s1544_s13] sm:$0xf]  ;;  %264 = vrot.lane.b32.xlu0 %v1217_v4, %s1419_s14  ;;  %v1218_v7 = vpack.c.bf16 %v271_v3, %v271_v3  ;;  %v412_v22 = vld [vmem:[%s1544_s13 + $0x4] sm:$0xf]  ;;  %v1227_v23 = vpack.c.bf16 %v386_v21, %v386_v21  ;;  %s1433_s14 = smov 65  }
  0x1d   : > { %288 = vrot.lane.b32.xlu1 %v1219_v5, %s1420_s15  ;;  %v1220_v8 = vpack.c.bf16 %v295_v6, %v295_v6  ;;  %v321_v9 = vld [vmem:[%s1544_s13] sm:$0xf]  ;;  %v1229_v24 = vpack.c.bf16 %v412_v22, %v412_v22  ;;  %v398_v25 = vld [vmem:[%s1544_s13 + $0x4] sm:$0xf]  ;;  %s1434_s15 = smov 67   ;;  %v1444_v5 = vmov 0.0  }
  0x1e   : > { %v307_v10 = vld [vmem:[%s1544_s13] sm:$0xf]  ;;  %v1222_v11 = vpack.c.bf16 %v321_v9, %v321_v9  ;;  %v429_v26 = vld [vmem:[%s1544_s13 + $0x4] sm:$0xf]  ;;  %v1228_v27 = vpack.c.bf16 %v398_v25, %v398_v25  ;;  %1247 = vmatprep.subr.bf16.mxu1 %v1444_v5 }
  0x1f   : > { %v1221_v12 = vpack.c.bf16 %v307_v10, %v307_v10  ;;  %v338_v13 = vld [vmem:[%s1544_s13] sm:$0xf]  ;;  %v1230_v28 = vpack.c.bf16 %v429_v26, %v429_v26  ;;  %v441_v29 = vld [vmem:[%s1544_s13 + $0x4] sm:$0xf] }
  0x20   : > { %276 = vrot.lane.b32.xlu0 %v1218_v7, %s1421_s16  ;;  %v350_v14 = vld [vmem:[%s1544_s13] sm:$0xf]  ;;  %v1223_v15 = vpack.c.bf16 %v338_v13, %v338_v13  ;;  %v453_v30 = vld [vmem:[%s1544_s13 + $0x4] sm:$0xf]  ;;  %v1231_v31 = vpack.c.bf16 %v441_v29, %v441_v29  ;;  %s1435_s13 = smov 126   ;;  %s1436_s16 = smov 127  }
  0x21   : > { %300 = vrot.lane.b32.xlu1 %v1220_v8, %s1422_s17  ;;  %v1224_v16 = vpack.c.bf16 %v350_v14, %v350_v14  ;;  %v1232_v32 = vpack.c.bf16 %v453_v30, %v453_v30  ;;  %s1437_s17 = smov 110  }
  0x24   : > { %326 = vrot.lane.b32.xlu0 %v1222_v11, %s1423_s18  ;;  %s1438_s18 = smov 109  }
  0x25   : > { %312 = vrot.lane.b32.xlu1 %v1221_v12, %s1424_s19  ;;  %s1439_s19 = smov 108  }
  0x28   : > { %343 = vrot.lane.b32.xlu0 %v1223_v15, %s1425_s20  ;;  %s1440_s20 = smov 92  }
  0x29   : > { %355 = vrot.lane.b32.xlu1 %v1224_v16, %s1426_s26  ;;  %s1441_s26 = smov 91  }
  0x2c   : > { %367 = vrot.lane.b32.xlu0 %v1225_v19, %s1427_s28  ;;  %s1442_s28 = smov 90  }
  0x2d   : > { %379 = vrot.lane.b32.xlu1 %v1226_v20, %s1428_s29  ;;  %s1443_s29 = smov 111  }
  0x30   : > { %391 = vrot.lane.b32.xlu0 %v1227_v23, %s1429_s9  ;;  %s1446_s9 = smov 36  }
  0x31   : > { %417 = vrot.lane.b32.xlu1 %v1229_v24, %s1430_s10 }
  0x34   : > { %403 = vrot.lane.b32.xlu0 %v1228_v27, %s1431_s11 }
  0x35   : > { %434 = vrot.lane.b32.xlu1 %v1230_v28, %s1432_s12 }
  0x38   : > { %446 = vrot.lane.b32.xlu0 %v1231_v31, %s1433_s14 }
  0x39   : > { %458 = vrot.lane.b32.xlu1 %v1232_v32, %s1434_s15 }
  0x8e   : > { %v265_v33 = vpop.permute.xlu0 %264 }
  0x8f   : > { %v289_v34 = vpop.permute.xlu1 %288  ;;  %268 = vst.msk [vmem:[#allocation2] sm:$0x3] %vm267_vm3, %v265_v33  ;;  %vm336_vm3 = vcmask 273536  }
  0x90   : > { %270 = vst.msk [vmem:[#allocation2] sm:$0xf] %vm269_vm4, %v1418_v0  ;;  %vm346_vm4 = vcmask 263304  }
  0x92   : > { %v277_v35 = vpop.permute.xlu0 %276 }
  0x93   : > { %v301_v36 = vpop.permute.xlu1 %300  ;;  %280 = vst.msk [vmem:[#allocation2] sm:$0x3] %vm279_vm5, %v277_v35  ;;  %vm348_vm5 = vcmask 421136  }
  0x94   : > { %282 = vst.msk [vmem:[#allocation2] sm:$0xf] %vm281_vm6, %v1418_v0  ;;  %vm358_vm6 = vcmask 410904  }
  0x95   : > { %292 = vst.msk [vmem:[#allocation2] sm:$0x3] %vm291_vm7, %v289_v34  ;;  %vm360_vm7 = vcmask 568736  }
  0x96   : > { %294 = vst.msk [vmem:[#allocation2] sm:$0xf] %vm293_vm8, %v1418_v0  ;;  %v327_v37 = vpop.permute.xlu0 %326  ;;  %vm370_vm8 = vcmask 558504  }
  0x97   : > { %v313_v38 = vpop.permute.xlu1 %312  ;;  %304 = vst.msk [vmem:[#allocation2] sm:$0x3] %vm303_vm9, %v301_v36  ;;  %v328_v39 = vrot.slane %v327_v37, 4  ;;  %vm372_vm9 = vcmask 716336  }
  0x98   : > { %306 = vst.msk [vmem:[#allocation2] sm:$0xf] %vm305_vm12, %v1418_v0  ;;  %vm394_vm12 = vcmask 853704  }
  0x99   : > { %v330_v40 = vsel %vm329_vm15, %v328_v39, %v327_v37  ;;  %316 = vst.msk [vmem:[#allocation2] sm:$0x3] %vm315_vm0, %v313_v38  ;;  %vm396_vm15 = vcmask 1011536   ;;  %vm423_vm0 = vcmask 1042408  }
  0x9a   : > { %320 = vst.msk [vmem:[#allocation2] sm:$0xff] %vm319_vm1, %v1418_v0  ;;  %v344_v41 = vpop.permute.xlu0 %343  ;;  %vm424_vm1 = vcmask 103428  }
  0x9b   : > { %v356_v42 = vpop.permute.xlu1 %355  ;;  %335 = vst.msk [vmem:[#allocation2] sm:$0x33] %vm334_vm2, %v330_v40  ;;  %vm406_vm2 = vcmask 1001304  }
  0x9c   : > { %337 = vst.msk [vmem:[#allocation2 + $0x4] sm:$0xf] %vm336_vm3, %v1418_v0  ;;  %vm420_vm3 = vcmask 498688  }
  0x9d   : > { %347 = vst.msk [vmem:[#allocation2 + $0x4] sm:$0x3] %vm346_vm4, %v344_v41  ;;  %vm410_vm4 = vmor %vm409_vm14, %vm408_vm13  ;;  %vm545_vm13 = vcmask 1043456   ;;  %vm488_vm14 = vcmask 1031168  }
  0x9e   : > { %349 = vst.msk [vmem:[#allocation2 + $0x4] sm:$0xf] %vm348_vm5, %v1418_v0  ;;  %v368_v43 = vpop.permute.xlu0 %367  ;;  %vm425_vm5 = vmor %vm424_vm1, %vm423_vm0  ;;  %vm515_vm0 = vcmask 883712   ;;  %vm506_vm1 = vcmask 891904  }
  0x9f   : > { %v380_v44 = vpop.permute.xlu1 %379  ;;  %359 = vst.msk [vmem:[#allocation2 + $0x4] sm:$0x3] %vm358_vm6, %v356_v42  ;;  %vm427_vm6 = vcmask 257136  }
  0xa0   : > { %361 = vst.msk [vmem:[#allocation2 + $0x4] sm:$0xf] %vm360_vm7, %v1418_v0  ;;  %vm437_vm7 = vcmask 246904  }
  0xa1   : > { %371 = vst.msk [vmem:[#allocation2 + $0x4] sm:$0x3] %vm370_vm8, %v368_v43  ;;  %vm439_vm8 = vcmask 404736  }
  0xa2   : > { %373 = vst.msk [vmem:[#allocation2 + $0x4] sm:$0xf] %vm372_vm9, %v1418_v0  ;;  %v392_v45 = vpop.permute.xlu0 %391  ;;  %vm449_vm9 = vcmask 394504  }
  0xa3   : > { %v418_v46 = vpop.permute.xlu1 %417  ;;  %383 = vst.msk [vmem:[#allocation2 + $0x4] sm:$0x3] %vm382_vm10, %v380_v44  ;;  %vm451_vm10 = vcmask 552336  }
  0xa4   : > { %385 = vst.msk [vmem:[#allocation2 + $0x4] sm:$0xf] %vm384_vm11, %v1418_v0  ;;  %v419_v47 = vrot.slane %v418_v46, 4  ;;  %vm461_vm11 = vcmask 542104  }
  0xa5   : > { %395 = vst.msk [vmem:[#allocation2 + $0x4] sm:$0x3] %vm394_vm12, %v392_v45  ;;  %vm479_vm12 = vcmask 1039360  }
  0xa6   : > { %397 = vst.msk [vmem:[#allocation2 + $0x4] sm:$0xf] %vm396_vm15, %v1418_v0  ;;  %v404_v48 = vpop.permute.xlu0 %403  ;;  %v421_v50 = vsel %vm420_vm3, %v419_v47, %v418_v46  ;;  %vm497_vm15 = vcmask 900096   ;;  %vm533_vm3 = vcmask 744448   ;;  %v583_v47 = vld [vmem:[%s1867_s2] sm:$0xff] }
  0xa7   : > { %v435_v49 = vpop.permute.xlu1 %434  ;;  %407 = vst.msk [vmem:[#allocation2 + $0x4] sm:$0x3] %vm406_vm2, %v404_v48  ;;  %vm524_vm2 = vcmask 752640  }
  0xa8   : > { %411 = vst.msk [vmem:[#allocation2 + $0x4] sm:$0xff] %vm410_vm4, %v1418_v0  ;;  %vm542_vm4 = vcmask 736256  }
  0xa9   : > { %426 = vst.msk [vmem:[#allocation2 + $0x4] sm:$0x33] %vm425_vm5, %v421_v50  ;;  %vm1445_vm5 = vmmov 0  }
  0xaa   : > { %428 = vst.msk [vmem:[#allocation2 + $0x8] sm:$0xf] %vm427_vm6, %v1418_v0  ;;  %v447_v51 = vpop.permute.xlu0 %446  ;;  %1257 = vmatprep.mubr.msk.bf16.mxu1 %vm1445_vm5, %v1444_v5  ;;  %vm631_vm6 = vcmask 908288  }
  0xab   : > { %438 = vst.msk [vmem:[#allocation2 + $0x8] sm:$0x3] %vm437_vm7, %v435_v49  ;;  %v459_v52 = vpop.permute.xlu1 %458  ;;  %vm654_vm7 = vcmask 588800  }
  0xac   : > { %440 = vst.msk [vmem:[#allocation2 + $0x8] sm:$0xf] %vm439_vm8, %v1418_v0  ;;  %vm792_vm8 = vcmask 1043744  }
  0xad   : > { %450 = vst.msk [vmem:[#allocation2 + $0x8] sm:$0x3] %vm449_vm9, %v447_v51  ;;  %vm793_vm9 = vcmask 1047556  }
  0xae   : > { %452 = vst.msk [vmem:[#allocation2 + $0x8] sm:$0xf] %vm451_vm10, %v1418_v0  ;;  %vm787_vm10 = vcmask 293888  }
  0xaf   : > { %462 = vst.msk [vmem:[#allocation2 + $0x8] sm:$0x3] %vm461_vm11, %v459_v52  ;;  %vm794_vm11 = vmor %vm793_vm9, %vm792_vm8 }
  0xb0   : > { %v463_v53 = vld [vmem:[#allocation2] sm:$0xff] }
  0xb1   : > { %v1579_v54 = vcombine.high %v463_v53, %v463_v53  ;;  %v1198_v55 = vcombine.low %v463_v53, %v463_v53 }
  0xb3   : > { %484 = vrot.lane.b32.xlu1 %v1579_v54, %s1435_s13  ;;  %475 = vrot.lane.b32.xlu0 %v1579_v54, %s1436_s16 }
  0xb6   : > { %v1349_v56 = vld [vmem:[#allocation2 + $0x8] ss:$0 sps:$4 sm:$0xff]  }
  0xb7   : > { %493 = vrot.lane.b32.xlu1 %v1579_v54, %s1437_s17  ;;  %473 = vrot.lane.b32.xlu0 %v1198_v55, %s1436_s16 }
  0xbb   : > { %482 = vrot.lane.b32.xlu1 %v1198_v55, %s1435_s13  ;;  %491 = vrot.lane.b32.xlu0 %v1198_v55, %s1437_s17 }
  0xbf   : > { %502 = vrot.lane.b32.xlu1 %v1579_v54, %s1438_s18  ;;  %509 = vrot.lane.b32.xlu0 %v1198_v55, %s1439_s19 }
  0xc3   : > { %511 = vrot.lane.b32.xlu1 %v1579_v54, %s1439_s19  ;;  %486 = vrot.lane.b32.xlu0 %v1349_v56, %s1435_s13 }
  0xc7   : > { %500 = vrot.lane.b32.xlu1 %v1198_v55, %s1438_s18  ;;  %495 = vrot.lane.b32.xlu0 %v1349_v56, %s1437_s17 }
  0xcb   : > { %504 = vrot.lane.b32.xlu0 %v1349_v56, %s1438_s18  ;;  %477 = vrot.lane.b32.xlu1 %v1349_v56, %s1436_s16 }
  0xcf   : > { %513 = vrot.lane.b32.xlu0 %v1349_v56, %s1439_s19  ;;  %520 = vrot.lane.b32.xlu1 %v1579_v54, %s1440_s20 }
  0xd3   : > { %522 = vrot.lane.b32.xlu0 %v1349_v56, %s1440_s20  ;;  %529 = vrot.lane.b32.xlu1 %v1579_v54, %s1441_s26 }
  0xd7   : > { %531 = vrot.lane.b32.xlu0 %v1349_v56, %s1441_s26  ;;  %518 = vrot.lane.b32.xlu1 %v1198_v55, %s1440_s20 }
  0xdb   : > { %527 = vrot.lane.b32.xlu0 %v1198_v55, %s1441_s26  ;;  %536 = vrot.lane.b32.xlu1 %v1198_v55, %s1442_s28 }
  0xdf   : > { %538 = vrot.lane.b32.xlu0 %v1579_v54, %s1442_s28  ;;  %540 = vrot.lane.b32.xlu1 %v1349_v56, %s1442_s28 }
 0x125   : > { %v485_v57 = vpop.permute.xlu1 %484  ;;  %v476_v58 = vpop.permute.xlu0 %475 }
 0x129   : > { %v494_v59 = vpop.permute.xlu1 %493  ;;  %v474_v60 = vpop.permute.xlu0 %473 }
 0x12a   : > { %v480_v61 = vsel %vm479_vm12, %v474_v60, %v476_v58 }
 0x12b   : > { %v548_v62 = vsel %vm545_vm13, %v1198_v55, %v480_v61 }
 0x12c   : > { %601 = vrot.lane.b32.xlu0 %v548_v62, %s1443_s29 }
 0x12d   : > { %v483_v63 = vpop.permute.xlu1 %482  ;;  %v492_v1 = vpop.permute.xlu0 %491 }
 0x12e   : > { %v489_v2 = vsel %vm488_vm14, %v483_v63, %v485_v57  ;;  %v498_v3 = vsel %vm497_vm15, %v492_v1, %v494_v59 }
 0x12f   : > { %v557_v4 = vsel %vm545_vm13, %v489_v2, %v498_v3 }
 0x130   : > { %607 = vrot.lane.b32.xlu1 %v557_v4, %s1443_s29 }
 0x131   : > { %v503_v6 = vpop.permute.xlu1 %502  ;;  %v510_v7 = vpop.permute.xlu0 %509 }
 0x135   : > { %v512_v8 = vpop.permute.xlu1 %511  ;;  %v487_v9 = vpop.permute.xlu0 %486 }
 0x136   : > { %v516_v12 = vsel %vm515_vm0, %v510_v7, %v512_v8  ;;  %v490_v25 = vsel %vm488_vm14, %v485_v57, %v487_v9 }
 0x139   : > { %v501_v10 = vpop.permute.xlu1 %500  ;;  %v496_v11 = vpop.permute.xlu0 %495 }
 0x13a   : > { %v507_v13 = vsel %vm506_vm1, %v501_v10, %v503_v6  ;;  %v563_v18 = vsel %vm545_vm13, %v487_v9, %v496_v11  ;;  %v499_v23 = vsel %vm497_vm15, %v494_v59, %v496_v11 }
 0x13b   : > { %v566_v14 = vsel %vm545_vm13, %v507_v13, %v516_v12  ;;  %v560_v28 = vsel %vm545_vm13, %v490_v25, %v499_v23  ;;  %v582_v12 = vld [vmem:[%s1866_s1] sm:$0xf] }
 0x13c   : > { %613 = vrot.lane.b32.xlu0 %v566_v14, %s1443_s29  ;;  %v753_v14 = vlaneseq }
 0x13d   : > { %v478_v15 = vpop.permute.xlu1 %477  ;;  %v505_v16 = vpop.permute.xlu0 %504 }
 0x13e   : > { %v554_v17 = vsel %vm545_vm13, %v1349_v56, %v478_v15  ;;  %v481_v19 = vsel %vm479_vm12, %v476_v58, %v478_v15  ;;  %v508_v33 = vsel %vm506_vm1, %v503_v6, %v505_v16  ;;  %v754_v15 = vshrl.u32 %v753_v14, 7 }
 0x13f   : > { %605 = vrot.lane.b32.xlu1 %v554_v17, %s1443_s29  ;;  %v551_v24 = vsel %vm545_vm13, %v1579_v54, %v481_v19 }
 0x140   : > { %611 = vrot.lane.b32.xlu0 %v563_v18, %s1443_s29  ;;  %v751_v18 = vld [vmem:[%s1870_s5] sm:$0x7]  ;;  %v755_v19 = vsub.s32 0, %v754_v15 }
 0x141   : > { %v521_v20 = vpop.permute.xlu1 %520  ;;  %v514_v21 = vpop.permute.xlu0 %513 }
 0x142   : > { %v572_v22 = vsel %vm545_vm13, %v505_v16, %v514_v21  ;;  %v517_v32 = vsel %vm515_vm0, %v512_v8, %v514_v21  ;;  %v763_v16 = vsub.s32 2, %v754_v15 }
 0x143   : > { %617 = vrot.lane.b32.xlu1 %v572_v22, %s1443_s29  ;;  %v569_v38 = vsel %vm545_vm13, %v508_v33, %v517_v32 }
 0x144   : > { %603 = vrot.lane.b32.xlu0 %v551_v24, %s1443_s29  ;;  %v764_v23 = vrot.slane %v751_v18, %v763_v16 }
 0x145   : > { %v530_v26 = vpop.permute.xlu1 %529  ;;  %v523_v27 = vpop.permute.xlu0 %522 }
 0x146   : > { %v526_v42 = vsel %vm524_vm2, %v521_v20, %v523_v27 }
 0x147   : > { %609 = vrot.lane.b32.xlu1 %v560_v28, %s1443_s29  ;;  %v756_v28 = vrot.slane %v751_v18, %v755_v19 }
 0x149   : > { %v519_v29 = vpop.permute.xlu1 %518  ;;  %v532_v30 = vpop.permute.xlu0 %531 }
 0x14a   : > { %v581_v31 = vsel %vm545_vm13, %v523_v27, %v532_v30  ;;  %v525_v35 = vsel %vm524_vm2, %v519_v29, %v521_v20  ;;  %v535_v40 = vsel %vm533_vm3, %v530_v26, %v532_v30  ;;  %v759_v20 = vsub.s32 1, %v754_v15 }
 0x14b   : > { %623 = vrot.lane.b32.xlu0 %v581_v31, %s1443_s29  ;;  %v578_v44 = vsel %vm545_vm13, %v526_v42, %v535_v40 }
 0x14c   : > { %v760_v32 = vrot.slane %v751_v18, %v759_v20 }
 0x14d   : > { %v528_v34 = vpop.permute.xlu0 %527  ;;  %v537_v36 = vpop.permute.xlu1 %536 }
 0x14e   : > { %v534_v37 = vsel %vm533_vm3, %v528_v34, %v530_v26 }
 0x14f   : > { %615 = vrot.lane.b32.xlu0 %v569_v38, %s1443_s29  ;;  %v575_v39 = vsel %vm545_vm13, %v525_v35, %v534_v37 }
 0x150   : > { %619 = vrot.lane.b32.xlu1 %v575_v39, %s1443_s29 }
 0x151   : > { %v539_v41 = vpop.permute.xlu0 %538  ;;  %v541_v45 = vpop.permute.xlu1 %540 }
 0x152   : > { %v543_v43 = vsel %vm542_vm4, %v537_v36, %v539_v41  ;;  %v544_v46 = vsel %vm542_vm4, %v539_v41, %v541_v45 }
 0x153   : > { %625 = vrot.lane.b32.xlu0 %v543_v43, %s1443_s29 }
 0x154   : > { %621 = vrot.lane.b32.xlu1 %v578_v44, %s1443_s29 }
 0x157   : > { %629 = vrot.lane.b32.xlu0 %v541_v45, %s1443_s29 }
 0x158   : > { %627 = vrot.lane.b32.xlu1 %v544_v46, %s1443_s29 }
 0x15c   : > { %586 = vperm.xlu1 %1347, %v583_v47  }
 0x19e   : > { %v602_v48 = vpop.permute.xlu0 %601 }
 0x1a2   : > { %v608_v49 = vpop.permute.xlu1 %607 }
 0x1ae   : > { %v614_v50 = vpop.permute.xlu0 %613 }
 0x1b1   : > { %v606_v51 = vpop.permute.xlu1 %605 }
 0x1b2   : > { %1248 = vmatpush3.bf16.msra.mxu1 %v606_v51  ;;  %v612_v52 = vpop.permute.xlu0 %611 }
 0x1b3   : > { %1249 = vmatprep.subr.bf16.mxu1 %v1444_v5 }
 0x1b5   : > { %v618_v53 = vpop.permute.xlu1 %617 }
 0x1b6   : > { %1250 = vmatpush3.bf16.msra.mxu1 %v612_v52  ;;  %v604_v54 = vpop.permute.xlu0 %603 }
 0x1b7   : > { %v633_v55 = vsel %vm631_vm6, %v604_v54, %v606_v51  ;;  %v632_v56 = vsel %vm631_vm6, %v602_v48, %v604_v54  ;;  %1251 = vmatprep.subr.bf16.mxu1 %v1444_v5 }
 0x1b8   : > { %667 = vmatprep.subr.bf16.mxu0 %v633_v55 }
 0x1b9   : > { %v610_v57 = vpop.permute.xlu1 %609  ;;  %668 = vmatpush1.bf16.msra.mxu0 %v632_v56 }
 0x1ba   : > { %1252 = vmatpush3.bf16.msra.mxu1 %v618_v53  ;;  %v635_v58 = vsel %vm631_vm6, %v610_v57, %v612_v52  ;;  %v634_v59 = vsel %vm631_vm6, %v608_v49, %v610_v57 }
 0x1bb   : > { %669 = vmatprep.subr.bf16.mxu0 %v635_v58  ;;  %1253 = vmatprep.subr.bf16.mxu1 %v1444_v5 }
 0x1bd   : > { %670 = vmatpush1.bf16.msra.mxu0 %v634_v59  ;;  %v624_v60 = vpop.permute.xlu0 %623 }
 0x1be   : > { %1254 = vmatpush3.bf16.msra.mxu1 %v624_v60 }
 0x1bf   : > { %1255 = vmatprep.subr.bf16.mxu1 %v1444_v5 }
 0x1c1   : > { %v616_v61 = vpop.permute.xlu0 %615 }
 0x1c2   : > { %v620_v62 = vpop.permute.xlu1 %619  ;;  %v637_v63 = vsel %vm631_vm6, %v616_v61, %v618_v53  ;;  %v636_v1 = vsel %vm631_vm6, %v614_v50, %v616_v61 }
 0x1c3   : > { %671 = vmatprep.subr.bf16.mxu0 %v637_v63 }
 0x1c4   : > { %672 = vmatpush1.bf16.msra.mxu0 %v636_v1 }
 0x1c5   : > { %v626_v2 = vpop.permute.xlu0 %625 }
 0x1c6   : > { %v622_v3 = vpop.permute.xlu1 %621 }
 0x1c7   : > { %v639_v4 = vsel %vm631_vm6, %v622_v3, %v624_v60  ;;  %v638_v6 = vsel %vm631_vm6, %v620_v62, %v622_v3 }
 0x1c8   : > { %673 = vmatprep.subr.bf16.mxu0 %v639_v4 }
 0x1c9   : > { %674 = vmatpush1.bf16.msra.mxu0 %v638_v6  ;;  %v630_v7 = vpop.permute.xlu0 %629 }
 0x1ca   : > { %v628_v8 = vpop.permute.xlu1 %627  ;;  %v665_v9 = vsel %vm545_vm13, %v630_v7, 0 }
 0x1cb   : > { %v640_v10 = vsel %vm631_vm6, %v626_v2, %v628_v8  ;;  %v641_v11 = vsel %vm631_vm6, %v628_v8, %v630_v7  ;;  %1256 = vmatpush3.bf16.msra.mxu1 %v665_v9 }
 0x1cc   : > { %1201 = vmatprep.subr.msk.bf16.mxu0 %vm545_vm13, %v641_v11  ;;  %v659_v13 = vsel %vm545_vm13, %v640_v10, 0  ;;  %1261 = vmatprep.subr.bf16.mxu1 %v1444_v5 }
 0x1cd   : > { %676 = vmatpush1.bf16.msra.mxu0 %v659_v13 }
 0x1ce   : > { %1258 = vmatmul.mubr.msk.bf16.vlgmr.msra.gmra.mrb[0].mxu1 %vm654_vm7, %v582_v12 }
 0x1cf   : > { %1271 = vmatprep.mubr.msk.bf16.mxu1 %vm1445_vm5, %v1444_v5  ;;  %vm796_vm5 = vcmask 551936  }
 0x1d0   : > { %1202 = vmatmul.mubr.msk.bf16.vlgmr.msra.gmra.mrb[0].mxu0 %vm654_vm7, %v582_v12 }
 0x1d1   : > { %1035 = vmatprep.mubr.bf16.mxu0 %v1418_v0 }
 0x1db   : > { %v587_v17 = vpop.permute.xlu1 %586 }
 0x2a1   : > { %v742_v21 = vpop.f32.mrb[0].mxu1 }
 0x2a2   : > { %v743_v22 = vadd.f32 %v742_v21, %v587_v17  ;;  %v1259_v24 = vpop.f32.mrb[1].mxu1 }
 0x2a3   : > { %v701_v25 = vpop.f32.mrb[0].mxu0  ;;  %v745_v26 = vpop.f32.mrb[2].mxu1 }
 0x2a4   : > { %v702_v27 = vadd.f32 %v701_v25, %v587_v17  ;;  %v703_v29 = vpop.f32.mrb[1].mxu0  ;;  %v750_v0 = vmax.f32 %v743_v22, 0.0  ;;  %v1260_v30 = vpop.f32.mrb[3].mxu1 }
 0x2a5   : > { %v704_v31 = vadd.f32 %v703_v29, %v587_v17  ;;  %v705_v33 = vpop.f32.mrb[2].mxu0 }
 0x2a6   : > { %v748_v34 = vmax.f32 %v702_v27, 0.0  ;;  %v770_v35 = vmul.f32 %v764_v23, %v750_v0  ;;  %v706_v36 = vpop.f32.mrb[3].mxu0 }
 0x2a7   : > { %v749_v37 = vmax.f32 %v704_v31, 0.0 }
 0x2a8   : > { %v768_v38 = vmul.f32 %v756_v28, %v748_v34  ;;  %v1234_v39 = vpack.c.bf16 %v770_v35, %v770_v35  ;;  %v910_v35 = vld [vmem:[%s1869_s4] sm:$0xff] }
 0x2a9   : > { %v769_v40 = vmul.f32 %v760_v32, %v749_v37 }
 0x2aa   : > { %784 = vrot.lane.b32.xlu1 %v1234_v39, %s1446_s9 }
 0x2ab   : > { %v1233_v41 = vpack.c.bf16 %v769_v40, %v768_v38 }
 0x2ad   : > { %782 = vrot.lane.b32.xlu0 %v1233_v41, %s1446_s9  ;;  %v911_v41 = vld [vmem:[%s1869_s4 + $0x8] sm:$0xff] }
 0x31c   : > { %v785_v44 = vpop.permute.xlu1 %784 }
 0x31f   : > { %v783_v42 = vpop.permute.xlu0 %782 }
 0x320   : > { %v786_v43 = vrot.slane %v783_v42, 4 }
 0x322   : > { %v788_v45 = vsel %vm787_vm10, %v786_v43, %v783_v42  ;;  %v789_v46 = vsel %vm787_vm10, %v786_v43, %v785_v44 }
 0x323   : > { %795 = vst.msk [vmem:[#allocation3] sm:$0xff] %vm794_vm11, %v788_v45 }
 0x324   : > { %797 = vst.msk [vmem:[#allocation3 + $0x8] sm:$0xf] %vm796_vm5, %v789_v46 }
 0x32a   : > { %v798_v47 = vld [vmem:[#allocation3] sm:$0xff] }
 0x32b   : > { %v1352_v48 = vld [vmem:[#allocation3 + $0x8] ss:$0 sps:$4 sm:$0xff]   ;;  %v1692_v49 = vcombine.high %v798_v47, %v798_v47  ;;  %v1697_v50 = vcombine.low %v798_v47, %v798_v47 }
 0x32c   : > { %812 = vrot.lane.b32.xlu1 %v1352_v48, %s1436_s16 }
 0x32d   : > { %810 = vrot.lane.b32.xlu0 %v1692_v49, %s1436_s16 }
 0x330   : > { %818 = vrot.lane.b32.xlu1 %v1692_v49, %s1435_s13 }
 0x331   : > { %808 = vrot.lane.b32.xlu0 %v1697_v50, %s1436_s16 }
 0x334   : > { %826 = vrot.lane.b32.xlu1 %v1692_v49, %s1437_s17 }
 0x335   : > { %820 = vrot.lane.b32.xlu0 %v1352_v48, %s1435_s13 }
 0x338   : > { %816 = vrot.lane.b32.xlu1 %v1697_v50, %s1435_s13  ;;  %s1447_s13 = smov [#allocation4]  }
 0x339   : > { %828 = vrot.lane.b32.xlu0 %v1352_v48, %s1437_s17  ;;  %s1358_s16 = sshll.u32 %s1447_s13, 4  ;;  %s1359_s16 = int_to_ptr.vmem [resolvable:$false] %s1358_s16 }
 0x33c   : > { %834 = vrot.lane.b32.xlu1 %v1692_v49, %s1438_s18 }
 0x33d   : > { %824 = vrot.lane.b32.xlu0 %v1697_v50, %s1437_s17  ;;  %s1360_s17 = scalar_lea.vmem %s1359_s16, 1536 }
 0x340   : > { %842 = vrot.lane.b32.xlu1 %v1692_v49, %s1439_s19 }
 0x341   : > { %836 = vrot.lane.b32.xlu0 %v1352_v48, %s1438_s18 }
 0x344   : > { %832 = vrot.lane.b32.xlu1 %v1697_v50, %s1438_s18 }
 0x345   : > { %844 = vrot.lane.b32.xlu0 %v1352_v48, %s1439_s19 }
 0x348   : > { %850 = vrot.lane.b32.xlu1 %v1692_v49, %s1440_s20 }
 0x349   : > { %840 = vrot.lane.b32.xlu0 %v1697_v50, %s1439_s19 }
 0x34c   : > { %858 = vrot.lane.b32.xlu1 %v1692_v49, %s1441_s26 }
 0x34d   : > { %852 = vrot.lane.b32.xlu0 %v1352_v48, %s1440_s20 }
 0x350   : > { %848 = vrot.lane.b32.xlu1 %v1697_v50, %s1440_s20 }
 0x351   : > { %860 = vrot.lane.b32.xlu0 %v1352_v48, %s1441_s26 }
 0x354   : > { %864 = vrot.lane.b32.xlu1 %v1697_v50, %s1442_s28 }
 0x355   : > { %856 = vrot.lane.b32.xlu0 %v1697_v50, %s1441_s26  ;;  %s242_s26 = sand.u32 1, %s1408_s22  }
 0x356   : > { %s1824_s15 = scalar_lea.sflag [#allocation5], %s242_s26 }
 0x358   : > { %868 = vrot.lane.b32.xlu1 %v1352_v48, %s1442_s28 }
 0x359   : > { %866 = vrot.lane.b32.xlu0 %v1692_v49, %s1442_s28  ;;  %s1275_s28 = smul.u32 48, %s242_s26 }
 0x35b   : > { %s244_s10 = scalar_lea.vmem [#allocation4], %s1275_s28 }
 0x35c   : > { %s1114_s11 = sshll.u32 %s244_s10, 4  ;;  %s1819_s11 = int_to_ptr.vmem [resolvable:$true] %s1114_s11 }
 0x35d   : > { %s1354_s9 = scalar_lea.vmem %s1819_s11, 768  ;;  %p1361_p0 = scmp.lt.s32.totalorder %s1819_s11, %s1359_s16 }
 0x35e   : > { %p1355_p11 = scmp.ne.s32.totalorder %s1819_s11, %s1354_s9  ;;  %p1362_p1 = scmp.lt.s32.totalorder %s1360_s17, %s1354_s9 }
 0x360   : > { %p1356_p12 = pnand %p1355_p11, %p1523_p5  ;;  %p1363_p2 = por %p1362_p1, %p1361_p0 }
 0x362   : > { %p1357_p13 = pneg %p1356_p12 }
 0x364   : > { %p1364_p3 = pnand %p1363_p2, %p1357_p13 }
 0x39e   : > { %v813_v51 = vpop.permute.xlu1 %812 }
 0x39f   : > { %v811_v52 = vpop.permute.xlu0 %810  ;;  %v880_v53 = vsel %vm545_vm13, %v1352_v48, %v813_v51 }
 0x3a0   : > { %943 = vrot.lane.b32.xlu1 %v880_v53, %s1443_s29  ;;  %v815_v21 = vsel %vm479_vm12, %v811_v52, %v813_v51 }
 0x3a1   : > { %v877_v27 = vsel %vm545_vm13, %v1692_v49, %v815_v21 }
 0x3a2   : > { %v819_v54 = vpop.permute.xlu1 %818 }
 0x3a3   : > { %v809_v55 = vpop.permute.xlu0 %808 }
 0x3a4   : > { %v814_v28 = vsel %vm479_vm12, %v809_v55, %v811_v52  ;;  %vm1095_vm12 = vcmask 261120  }
 0x3a5   : > { %v874_v31 = vsel %vm545_vm13, %v1697_v50, %v814_v28 }
 0x3a6   : > { %v827_v56 = vpop.permute.xlu1 %826 }
 0x3a7   : > { %v821_v57 = vpop.permute.xlu0 %820 }
 0x3a8   : > { %v823_v8 = vsel %vm488_vm14, %v819_v54, %v821_v57 }
 0x3aa   : > { %v817_v58 = vpop.permute.xlu1 %816 }
 0x3ab   : > { %v829_v59 = vpop.permute.xlu0 %828  ;;  %v822_v13 = vsel %vm488_vm14, %v817_v58, %v819_v54 }
 0x3ac   : > { %v889_v60 = vsel %vm545_vm13, %v821_v57, %v829_v59  ;;  %v831_v6 = vsel %vm497_vm15, %v827_v56, %v829_v59 }
 0x3ad   : > { %949 = vrot.lane.b32.xlu0 %v889_v60, %s1443_s29  ;;  %v886_v10 = vsel %vm545_vm13, %v823_v8, %v831_v6 }
 0x3ae   : > { %v835_v61 = vpop.permute.xlu1 %834 }
 0x3af   : > { %v825_v62 = vpop.permute.xlu0 %824 }
 0x3b0   : > { %v830_v11 = vsel %vm497_vm15, %v825_v62, %v827_v56 }
 0x3b1   : > { %v883_v15 = vsel %vm545_vm13, %v822_v13, %v830_v11 }
 0x3b2   : > { %v843_v63 = vpop.permute.xlu1 %842 }
 0x3b3   : > { %v837_v1 = vpop.permute.xlu0 %836 }
 0x3b4   : > { %v839_v34 = vsel %vm506_vm1, %v835_v61, %v837_v1 }
 0x3b6   : > { %v833_v2 = vpop.permute.xlu1 %832 }
 0x3b7   : > { %v845_v3 = vpop.permute.xlu0 %844  ;;  %v838_v38 = vsel %vm506_vm1, %v833_v2, %v835_v61 }
 0x3b8   : > { %v898_v4 = vsel %vm545_vm13, %v837_v1, %v845_v3  ;;  %v847_v33 = vsel %vm515_vm0, %v843_v63, %v845_v3 }
 0x3b9   : > { %955 = vrot.lane.b32.xlu1 %v898_v4, %s1443_s29  ;;  %v895_v36 = vsel %vm545_vm13, %v839_v34, %v847_v33  ;;  %v1353_v4 = vld [vmem:[%s1868_s3] sm:$0xff]  }
 0x3ba   : > { %v851_v7 = vpop.permute.xlu1 %850 }
 0x3bb   : > { %v841_v9 = vpop.permute.xlu0 %840 }
 0x3bc   : > { %v846_v37 = vsel %vm515_vm0, %v841_v9, %v843_v63 }
 0x3bd   : > { %947 = vrot.lane.b32.xlu1 %v886_v10, %s1443_s29  ;;  %v892_v39 = vsel %vm545_vm13, %v838_v38, %v846_v37 }
 0x3be   : > { %v859_v12 = vpop.permute.xlu1 %858 }
 0x3bf   : > { %v853_v14 = vpop.permute.xlu0 %852 }
 0x3c0   : > { %v855_v18 = vsel %vm524_vm2, %v851_v7, %v853_v14 }
 0x3c1   : > { %945 = vrot.lane.b32.xlu1 %v883_v15, %s1443_s29 }
 0x3c2   : > { %v849_v16 = vpop.permute.xlu1 %848 }
 0x3c3   : > { %v861_v17 = vpop.permute.xlu0 %860  ;;  %v854_v25 = vsel %vm524_vm2, %v849_v16, %v851_v7 }
 0x3c4   : > { %v863_v19 = vsel %vm533_vm3, %v859_v12, %v861_v17  ;;  %v907_v20 = vsel %vm545_vm13, %v853_v14, %v861_v17 }
 0x3c5   : > { %961 = vrot.lane.b32.xlu0 %v907_v20, %s1443_s29  ;;  %v904_v22 = vsel %vm545_vm13, %v855_v18, %v863_v19 }
 0x3c6   : > { %959 = vrot.lane.b32.xlu1 %v904_v22, %s1443_s29  ;;  %v865_v23 = vpop.permute.xlu1 %864 }
 0x3c7   : > { %v857_v24 = vpop.permute.xlu0 %856 }
 0x3c8   : > { %v862_v26 = vsel %vm533_vm3, %v857_v24, %v859_v12 }
 0x3c9   : > { %941 = vrot.lane.b32.xlu0 %v877_v27, %s1443_s29  ;;  %v901_v29 = vsel %vm545_vm13, %v854_v25, %v862_v26 }
 0x3ca   : > { %957 = vrot.lane.b32.xlu1 %v901_v29, %s1443_s29  ;;  %v869_v0 = vpop.permute.xlu1 %868 }
 0x3cb   : > { %v867_v30 = vpop.permute.xlu0 %866 }
 0x3cc   : > { %v871_v32 = vsel %vm542_vm4, %v867_v30, %v869_v0  ;;  %v870_v40 = vsel %vm542_vm4, %v865_v23, %v867_v30 }
 0x3cd   : > { %939 = vrot.lane.b32.xlu0 %v874_v31, %s1443_s29 }
 0x3ce   : > { %965 = vrot.lane.b32.xlu1 %v871_v32, %s1443_s29 }
 0x3d1   : > { %953 = vrot.lane.b32.xlu0 %v895_v36, %s1443_s29 }
 0x3d2   : > { %914 = vperm.xlu1 %1347, %v910_v35  }
 0x3d5   : > { %951 = vrot.lane.b32.xlu0 %v892_v39, %s1443_s29 }
 0x3d9   : > { %963 = vrot.lane.b32.xlu0 %v870_v40, %s1443_s29 }
 0x3dd   : > { %967 = vrot.lane.b32.xlu0 %v869_v0, %s1443_s29  ;;  %s1276_s29 = smul.u32 768, %s1506_s25 }
 0x3df   : > { %s1817_s14 = scalar_lea.hbm %s1871_s6, %s1276_s29 }
 0x3e1   : > { %919 = vperm.xlu0 %1348, %v911_v41  }
 0x412   : > { %v944_v42 = vpop.permute.xlu1 %943 }
 0x413   : > { %1262 = vmatpush3.bf16.msra.mxu1 %v944_v42 }
 0x414   : > { %1263 = vmatprep.subr.bf16.mxu1 %v1444_v5 }
 0x41f   : > { %v950_v43 = vpop.permute.xlu0 %949 }
 0x420   : > { %1264 = vmatpush3.bf16.msra.mxu1 %v950_v43 }
 0x421   : > { %1265 = vmatprep.subr.bf16.mxu1 %v1444_v5 }
 0x42b   : > { %v956_v44 = vpop.permute.xlu1 %955 }
 0x42c   : > { %1266 = vmatpush3.bf16.msra.mxu1 %v956_v44 }
 0x42d   : > { %1267 = vmatprep.subr.bf16.mxu1 %v1444_v5 }
 0x42f   : > { %v948_v45 = vpop.permute.xlu1 %947 }
 0x430   : > { %v972_v53 = vsel %vm631_vm6, %v948_v45, %v950_v43 }
 0x433   : > { %v946_v47 = vpop.permute.xlu1 %945 }
 0x434   : > { %v971_v55 = vsel %vm631_vm6, %v946_v47, %v948_v45 }
 0x437   : > { %v962_v46 = vpop.permute.xlu0 %961 }
 0x438   : > { %1268 = vmatpush3.bf16.msra.mxu1 %v962_v46  ;;  %v960_v52 = vpop.permute.xlu1 %959 }
 0x439   : > { %1269 = vmatprep.subr.bf16.mxu1 %v1444_v5  ;;  %v976_v59 = vsel %vm631_vm6, %v960_v52, %v962_v46 }
 0x43b   : > { %v942_v48 = vpop.permute.xlu0 %941 }
 0x43c   : > { %v970_v49 = vsel %vm631_vm6, %v942_v48, %v944_v42  ;;  %v958_v5 = vpop.permute.xlu1 %957 }
 0x43d   : > { %1003 = vmatprep.subr.bf16.mxu0 %v970_v49  ;;  %v975_v61 = vsel %vm631_vm6, %v958_v5, %v960_v52 }
 0x43f   : > { %v940_v50 = vpop.permute.xlu0 %939 }
 0x440   : > { %v969_v51 = vsel %vm631_vm6, %v940_v50, %v942_v48  ;;  %v966_v62 = vpop.permute.xlu1 %965 }
 0x441   : > { %1004 = vmatpush1.bf16.msra.mxu0 %v969_v51 }
 0x442   : > { %1005 = vmatprep.subr.bf16.mxu0 %v972_v53 }
 0x443   : > { %v954_v54 = vpop.permute.xlu0 %953 }
 0x444   : > { %v974_v56 = vsel %vm631_vm6, %v954_v54, %v956_v44 }
 0x445   : > { %1006 = vmatpush1.bf16.msra.mxu0 %v971_v55 }
 0x446   : > { %1007 = vmatprep.subr.bf16.mxu0 %v974_v56 }
 0x447   : > { %v952_v57 = vpop.permute.xlu0 %951 }
 0x448   : > { %v973_v58 = vsel %vm631_vm6, %v952_v57, %v954_v54 }
 0x449   : > { %1008 = vmatpush1.bf16.msra.mxu0 %v973_v58 }
 0x44a   : > { %1009 = vmatprep.subr.bf16.mxu0 %v976_v59 }
 0x44b   : > { %v964_v60 = vpop.permute.xlu0 %963 }
 0x44c   : > { %v977_v63 = vsel %vm631_vm6, %v964_v60, %v966_v62 }
 0x44d   : > { %1010 = vmatpush1.bf16.msra.mxu0 %v975_v61  ;;  %v995_v6 = vsel %vm545_vm13, %v977_v63, 0 }
 0x44f   : > { %v968_v1 = vpop.permute.xlu0 %967 }
 0x450   : > { %v978_v2 = vsel %vm631_vm6, %v966_v62, %v968_v1  ;;  %v1001_v3 = vsel %vm545_vm13, %v968_v1, 0 }
 0x451   : > { %1210 = vmatprep.subr.msk.bf16.mxu0 %vm545_vm13, %v978_v2  ;;  %1270 = vmatpush3.bf16.msra.mxu1 %v1001_v3  ;;  %v915_v7 = vpop.permute.xlu1 %914 }
 0x452   : > { %1012 = vmatpush1.bf16.msra.mxu0 %v995_v6 }
 0x454   : > { %1272 = vmatmul.mubr.msk.bf16.vlgmr.msra.gmra.mrb[4].mxu1 %vm654_vm7, %v1353_v4 }
 0x455   : > { %1211 = vmatmul.mubr.msk.bf16.vlgmr.msra.gmra.mrb[4].mxu0 %vm654_vm7, %v1353_v4 }
 0x460   : > { %v920_v9 = vpop.permute.xlu0 %919 }
 0x527   : > { %v1080_v8 = vpop.f32.mrb[4].mxu1 }
 0x528   : > { %v1081_v10 = vadd.f32 %v1080_v8, %v915_v7  ;;  %v1037_v11 = vpop.f32.mrb[4].mxu0  ;;  %v1273_v12 = vpop.f32.mrb[5].mxu1 }
 0x529   : > { %v1038_v13 = vadd.f32 %v1037_v11, %v915_v7  ;;  %v1039_v14 = vpop.f32.mrb[5].mxu0  ;;  %v1083_v15 = vpop.f32.mrb[6].mxu1 }
 0x52a   : > { %v1089_v16 = vmax.f32 %v1081_v10, 0.0  ;;  %v1040_v17 = vadd.f32 %v1039_v14, %v915_v7  ;;  %v1084_v18 = vadd.f32 %v1083_v15, %v920_v9  ;;  %v1041_v19 = vpop.f32.mrb[6].mxu0  ;;  %v1274_v20 = vpop.f32.mrb[7].mxu1 }
 0x52b   : > { %v1087_v21 = vmax.f32 %v1038_v13, 0.0  ;;  %v1042_v22 = vadd.f32 %v1041_v19, %v920_v9  ;;  %v1043_v23 = vpop.f32.mrb[7].mxu0 }
 0x52c   : > { %1096 = vst.msk [vmem:[%s244_s10 + $0x10] sm:$0xff] %vm1095_vm12, %v1089_v16  ;;  %v1088_v24 = vmax.f32 %v1040_v17, 0.0  ;;  %v1092_v25 = vmax.f32 %v1084_v18, 0.0  ;;  %v1044_v26 = vadd.f32 %v1043_v23, %v920_v9 }
 0x52d   : > { %1093 = vst [vmem:[%s244_s10] sm:$0xff] %v1087_v21  ;;  %v1090_v27 = vmax.f32 %v1042_v22, 0.0 }
 0x52e   : > { %1094 = vst [vmem:[%s244_s10 + $0x8] sm:$0xff] %v1088_v24  ;;  %1099 = vst.msk [vmem:[%s244_s10 + $0x28] sm:$0xff] %vm1095_vm12, %v1092_v25  ;;  %v1091_v28 = vmax.f32 %v1044_v26, 0.0 }
 0x52f   : > { %1097 = vst [vmem:[%s244_s10 + $0x18] sm:$0xff] %v1090_v27 }
 0x530   : > { %1098 = vst [vmem:[%s244_s10 + $0x20] sm:$0xff] %v1091_v28 }
 0x531   : > { %1367 = shalt.err (!%p1364_p3)
}
 0x532   : > { %s1368_s18 = scalar_lea.hbm %s1817_s14, 768  ;;  %s1372_s26 = scalar_lea.hbm %s1871_s6, 1536 }
 0x533   : > { %p1369_p4 = scmp.ne.s32.totalorder %s1817_s14, %s1368_s18  ;;  %p1373_p9 = scmp.lt.u32.totalorder %s1817_s14, %s1871_s6 }
 0x534   : > { %p1374_p10 = scmp.lt.u32.totalorder %s1372_s26, %s1368_s18  ;;  %p1376_p12 = scmp.lt.u32.totalorder %s1368_s18, %s1817_s14 }
 0x535   : > { %p1370_p7 = pnand %p1369_p4, %p1523_p5 }
 0x536   : > { %p1375_p11 = por %p1374_p10, %p1373_p9 }
 0x537   : > { %p1371_p8 = pneg %p1370_p7 }
 0x538   : > { %p1377_p13 = por %p1376_p12, %p1375_p11 }
 0x53a   : > { %p1378_p0 = pnand %p1377_p13, %p1371_p8 }
 0x53c   : > { %1381 = shalt.err (!%p1378_p0)
}
 0x53d   : > { %s1448_s10 = smov 384   ;;  %s1449_s25 = smov 24  }
 0x53e   : > { %1277 = dma.vmem_to_hbm [thread:$0]  (%p1523_p5), %s1819_s11, 768, %s1817_s14, %s1824_s15, %s1448_s10, %s1448_s10, %s1449_s25  }
 0x53f PF: > { %p1283_p1 = scmp.ge.s32.totalorder %s1416_s24, 2  ;;  %s1129_s12 = sand.u32 1, %s1404_s21  }
 0x540   : > { %s1130_s9 = scalar_lea.sflag [#allocation5], %s1129_s12 }
 0x541   : > { %p1280_p2 = pnand %p1283_p1, %p1527_p6 }
 0x543   : > { %1399 = dma.done.wait (!%p1280_p2), %s1130_s9, 768  }
 0x544   : > { %1401 = vsyncadd (!%p1280_p2), %s1130_s9, 4294966528  ;;  %p16_p3 = scmp.ge.s32.totalorder %s1510_s27, 4   ;;  %s1874_s21 = smov %s1408_s22 }
 0x545   : > { %s1875_s22 = smov %s1412_s23  ;;  %s1876_s23 = smov %s1521_s30 }
 0x546   : > { %s1877_s24 = smov %s1510_s27  ;;  %18 = sbr.rel (!%p16_p3) target bundleno = 3 (0x3), region = 79 }
 0x54d   :  { %1135 = vsyncpa [#allocation5], 1 }
 0x54e   :  { %1137 = vsyncpa [#allocation5 + $0x1], 1 }

</bundles_post_ra>
